<compile_context>
chip_gen: v6e
topology: v6e:2x2x1
jax: 0.10.0
libtpu: 0.0.40
codegen_flags: <defaults>
</compile_context>

<pallas_src>
import functools
import math

import jax
import jax.numpy as jnp
from jax import lax
from jax.experimental import pallas as pl
from jax.experimental.pallas import tpu as pltpu


def _round_up(x, m):
    return (x + m - 1) // m * m


_M_ROWS = 8   # MXU M rows built per tile (>= segs, one full sublane group)


def _s4_ptd_kernel(par_ref, t_ref, k_ref, *, segs):
    # par_ref: (6, Hb, 1, Nh) = [cp_re, cp_im, dta_re, dta_im, step_re, step_im]
    # t_ref  : (Hb, 2*Nh, 128), rows [:Nh]=Re exp(dtA*j), rows [Nh:]=Im exp(dtA*j)
    # k_ref  : (Hb, segs, 128) block of the (H, L/128, 128) output
    cp_re = par_ref[0]      # (Hb, 1, Nh)
    cp_im = par_ref[1]
    da_re = par_ref[2]
    da_im = par_ref[3]
    st_re = par_ref[4]      # step = exp(dtA * 128)
    st_im = par_ref[5]

    tile_l = segs * 128

    # Exact re-base at the start of every L tile: E0 = exp(dtA * l0).
    # (l0 fits exactly in f32 for L < 2^24.)
    l0 = (pl.program_id(1) * tile_l).astype(jnp.float32)
    ph_re = da_re * l0
    ph_im = da_im * l0
    mag = jnp.exp(ph_re)
    e_re = mag * jnp.cos(ph_im)
    e_im = mag * jnp.sin(ph_im)

    # W_0 = C' * E0 ;  W_{s+1} = W_s * step   (complex recursion, VALU only)
    w_re = cp_re * e_re - cp_im * e_im       # (Hb, 1, Nh)
    w_im = cp_re * e_im + cp_im * e_re
    wre, wim = [], []
    for s in range(_M_ROWS):
        wre.append(w_re)
        wim.append(w_im)
        if s + 1 < _M_ROWS:
            w_re, w_im = (w_re * st_re - w_im * st_im,
                          w_re * st_im + w_im * st_re)
    w_re_all = jnp.concatenate(wre, axis=1)                  # (Hb, 8, Nh)
    w_im_all = jnp.concatenate(wim, axis=1)                  # (Hb, 8, Nh)

    # Re(W * T) = W_re*T_re - W_im*T_im  ->  one batched MXU matmul over k=2Nh.
    lhs = jnp.concatenate([w_re_all, -w_im_all], axis=2)     # (Hb, 8, 2Nh)
    acc = lax.dot_general(
        lhs, t_ref[...],
        dimension_numbers=(((2,), (1,)), ((0,), (0,))),
        preferred_element_type=jnp.float32)                  # (Hb, 8, 128)

    if segs == _M_ROWS:
        k_ref[...] = 2.0 * acc
    else:
        k_ref[...] = 2.0 * acc[:, :segs, :]


def s4_ptd_forward(log_dt, c_re, c_im, log_a_real, a_imag, L):
    """Pallas implementation of S4_PTD_Kernel.forward(L) -> (H, L) float32."""
    H, Nh = c_re.shape
    f32 = jnp.float32

    # ---- L tiling: Lt = segs*128 lanes (segs up to 8) ----------------------
    segs = max(1, min(8, (L + 127) // 128))
    Lt = 128 * segs
    L_pad = _round_up(L, Lt)

    # ---- H padding / blocking ----------------------------------------------
    H_pad = _round_up(H, 8)
    Hb = 8
    for cand in (32, 16):
        if H_pad % cand == 0 and H_pad // cand >= 2:
            Hb = cand
            break

    # ---- L-invariant parameter prep (hoisted out of the kernel, plain XLA) --
    dt = jnp.exp(log_dt.astype(f32))                              # (H,)
    C = c_re.astype(f32) + 1j * c_im.astype(f32)                  # (H, Nh) c64
    A = -jnp.exp(log_a_real.astype(f32)) - 1j * a_imag.astype(f32)
    dtA = A * dt[:, None]                                         # (H, Nh) c64
    Cp = C * (jnp.exp(dtA) - 1.0) / A                             # (H, Nh) c64
    step = jnp.exp(dtA * 128.0)                                   # (H, Nh) c64

    # Intra-segment power table T[h, n, j] = exp(dtA[h, n] * j), j = 0..127.
    jj = jnp.arange(128, dtype=f32)
    T_c = jnp.exp(dtA[:, :, None] * jj)                           # (H, Nh, 128)
    T = jnp.concatenate([T_c.real, T_c.imag], axis=1).astype(f32)  # (H, 2Nh, 128)

    par = jnp.stack([Cp.real, Cp.imag, dtA.real, dtA.imag,
                     step.real, step.imag], axis=0).astype(f32)   # (6, H, Nh)

    if H_pad != H:
        par = jnp.pad(par, ((0, 0), (0, H_pad - H), (0, 0)))
        T = jnp.pad(T, ((0, H_pad - H), (0, 0), (0, 0)))
    par = par.reshape(6, H_pad, 1, Nh)

    # ---- pallas_call ---------------------------------------------------------
    grid = (H_pad // Hb, L_pad // Lt)
    kernel = functools.partial(_s4_ptd_kernel, segs=segs)

    out = pl.pallas_call(
        kernel,
        out_shape=jax.ShapeDtypeStruct((H_pad, L_pad // 128, 128), jnp.float32),
        grid_spec=pltpu.PrefetchScalarGridSpec(
            num_scalar_prefetch=0,
            grid=grid,
            in_specs=[
                # packed params: depends only on the H block (revisited over L)
                pl.BlockSpec((6, Hb, 1, Nh), lambda i, j: (0, i, 0, 0)),
                # hoisted power table: depends only on the H block
                pl.BlockSpec((Hb, 2 * Nh, 128), lambda i, j: (i, 0, 0)),
            ],
            out_specs=pl.BlockSpec((Hb, segs, 128), lambda i, j: (i, j, 0)),
        ),
        compiler_params=pltpu.CompilerParams(
            dimension_semantics=("parallel", "parallel")),
    )(par, T)

    # (H_pad, L_pad/128, 128) -> (H_pad, L_pad): free contiguous merge.
    K = out.reshape(H_pad, L_pad)
    if H_pad != H or L_pad != L:
        K = K[:H, :L]   # only copies when padding was actually needed
    return K


def s4_ptd_reference(log_dt, c_re, c_im, log_a_real, a_imag, L):
    """Pure-JAX complex reference matching the PyTorch forward."""
    dt = jnp.exp(log_dt)
    C = c_re + 1j * c_im
    A = -jnp.exp(log_a_real) - 1j * a_imag
    dtA = A * dt[:, None]
    K = dtA[:, :, None] * jnp.arange(L, dtype=jnp.float32)
    Cp = C * (jnp.exp(dtA) - 1.0) / A
    return 2.0 * jnp.einsum('hn,hnl->hl', Cp, jnp.exp(K)).real


if __name__ == "__main__":
    # Small shapes consistent with the module: d_model=H=8, N=64 -> Nh=32, L=16
    H = 8
    N = 64
    Nh = N // 2
    L = 16
    dt_min, dt_max = 0.001, 0.1

    key = jax.random.PRNGKey(0)
    k1, k2, k3, k4 = jax.random.split(key, 4)

    # Deterministic parameter init matching __init__ shapes:
    #   self.C          : (H, Nh, 2)  (view_as_real of complex C)
    #   self.log_dt     : (H,)
    #   self.log_A_real : (H, Nh)
    #   self.A_imag     : (H, Nh)
    C_param = jax.random.normal(k1, (H, Nh, 2), dtype=jnp.float32)
    log_dt = (jax.random.uniform(k2, (H,), dtype=jnp.float32)
              * (math.log(dt_max) - math.log(dt_min)) + math.log(dt_min))
    log_A_real = jnp.log(0.5 + jax.random.uniform(k3, (H, Nh), dtype=jnp.float32) * float(Nh))
    A_imag = jax.random.normal(k4, (H, Nh), dtype=jnp.float32) * math.pi

    c_re = C_param[..., 0]
    c_im = C_param[..., 1]

    K = s4_ptd_forward(log_dt, c_re, c_im, log_A_real, A_imag, L)
    K = jax.block_until_ready(K)

    K_ref = s4_ptd_reference(log_dt, c_re, c_im, log_A_real, A_imag, L)
    assert K.shape == (H, L)
    assert jnp.allclose(K, K_ref, rtol=1e-4, atol=1e-4), "mismatch vs reference"

    print("KERNEL_OK")
</pallas_src>

<mosaic_0001>
module attributes {stable_mosaic.version = 11 : i64} {
  func.func @_s4_ptd_kernel(%arg0: i32, %arg1: i32, %arg2: memref<6x8x1x32xf32, #tpu.memory_space<vmem>>, %arg3: memref<8x64x128xf32, #tpu.memory_space<vmem>>, %arg4: memref<8x1x128xf32, #tpu.memory_space<vmem>>) attributes {dimension_semantics = [#tpu.dimension_semantics<parallel>, #tpu.dimension_semantics<parallel>], iteration_bounds = array<i64: 1, 1>, scalar_prefetch = 0 : i64, scratch_operands = 0 : i64, tpu.core_type = #tpu.core_type<tc>, window_params = [{transform_indices = @transform_0, window_bounds = array<i64: 6, 8, 1, 32>}, {transform_indices = @transform_1, window_bounds = array<i64: 8, 64, 128>}, {transform_indices = @transform_2, window_bounds = array<i64: 8, 1, 128>}]} {
    %c0 = arith.constant 0 : index
    %c0_0 = arith.constant 0 : index
    %c0_1 = arith.constant 0 : index
    %c0_2 = arith.constant 0 : index
    %0 = vector.load %arg2[%c0, %c0_0, %c0_1, %c0_2] : memref<6x8x1x32xf32, #tpu.memory_space<vmem>>, vector<1x8x1x32xf32>
    %1 = vector.shape_cast %0 : vector<1x8x1x32xf32> to vector<8x1x32xf32>
    %c1 = arith.constant 1 : index
    %c0_3 = arith.constant 0 : index
    %c0_4 = arith.constant 0 : index
    %c0_5 = arith.constant 0 : index
    %2 = vector.load %arg2[%c1, %c0_3, %c0_4, %c0_5] : memref<6x8x1x32xf32, #tpu.memory_space<vmem>>, vector<1x8x1x32xf32>
    %3 = vector.shape_cast %2 : vector<1x8x1x32xf32> to vector<8x1x32xf32>
    %c2 = arith.constant 2 : index
    %c0_6 = arith.constant 0 : index
    %c0_7 = arith.constant 0 : index
    %c0_8 = arith.constant 0 : index
    %4 = vector.load %arg2[%c2, %c0_6, %c0_7, %c0_8] : memref<6x8x1x32xf32, #tpu.memory_space<vmem>>, vector<1x8x1x32xf32>
    %5 = vector.shape_cast %4 : vector<1x8x1x32xf32> to vector<8x1x32xf32>
    %c3 = arith.constant 3 : index
    %c0_9 = arith.constant 0 : index
    %c0_10 = arith.constant 0 : index
    %c0_11 = arith.constant 0 : index
    %6 = vector.load %arg2[%c3, %c0_9, %c0_10, %c0_11] : memref<6x8x1x32xf32, #tpu.memory_space<vmem>>, vector<1x8x1x32xf32>
    %7 = vector.shape_cast %6 : vector<1x8x1x32xf32> to vector<8x1x32xf32>
    %c4 = arith.constant 4 : index
    %c0_12 = arith.constant 0 : index
    %c0_13 = arith.constant 0 : index
    %c0_14 = arith.constant 0 : index
    %8 = vector.load %arg2[%c4, %c0_12, %c0_13, %c0_14] : memref<6x8x1x32xf32, #tpu.memory_space<vmem>>, vector<1x8x1x32xf32>
    %9 = vector.shape_cast %8 : vector<1x8x1x32xf32> to vector<8x1x32xf32>
    %c5 = arith.constant 5 : index
    %c0_15 = arith.constant 0 : index
    %c0_16 = arith.constant 0 : index
    %c0_17 = arith.constant 0 : index
    %10 = vector.load %arg2[%c5, %c0_15, %c0_16, %c0_17] : memref<6x8x1x32xf32, #tpu.memory_space<vmem>>, vector<1x8x1x32xf32>
    %11 = vector.shape_cast %10 : vector<1x8x1x32xf32> to vector<8x1x32xf32>
    %c128_i32 = arith.constant 128 : i32
    %12 = arith.muli %arg1, %c128_i32 : i32
    %13 = arith.sitofp %12 : i32 to f32
    %14 = vector.broadcast %13 : f32 to vector<8x1x32xf32>
    %15 = arith.mulf %5, %14 : vector<8x1x32xf32>
    %16 = vector.broadcast %13 : f32 to vector<8x1x32xf32>
    %17 = arith.mulf %7, %16 : vector<8x1x32xf32>
    %18 = math.exp %15 : vector<8x1x32xf32>
    %19 = math.cos %17 : vector<8x1x32xf32>
    %20 = arith.mulf %18, %19 : vector<8x1x32xf32>
    %21 = math.sin %17 : vector<8x1x32xf32>
    %22 = arith.mulf %18, %21 : vector<8x1x32xf32>
    %23 = arith.mulf %1, %20 : vector<8x1x32xf32>
    %24 = arith.mulf %3, %22 : vector<8x1x32xf32>
    %25 = arith.subf %23, %24 : vector<8x1x32xf32>
    %26 = arith.mulf %1, %22 : vector<8x1x32xf32>
    %27 = arith.mulf %3, %20 : vector<8x1x32xf32>
    %28 = arith.addf %26, %27 : vector<8x1x32xf32>
    %29 = arith.mulf %25, %9 : vector<8x1x32xf32>
    %30 = arith.mulf %28, %11 : vector<8x1x32xf32>
    %31 = arith.subf %29, %30 : vector<8x1x32xf32>
    %32 = arith.mulf %25, %11 : vector<8x1x32xf32>
    %33 = arith.mulf %28, %9 : vector<8x1x32xf32>
    %34 = arith.addf %32, %33 : vector<8x1x32xf32>
    %35 = arith.mulf %31, %9 : vector<8x1x32xf32>
    %36 = arith.mulf %34, %11 : vector<8x1x32xf32>
    %37 = arith.subf %35, %36 : vector<8x1x32xf32>
    %38 = arith.mulf %31, %11 : vector<8x1x32xf32>
    %39 = arith.mulf %34, %9 : vector<8x1x32xf32>
    %40 = arith.addf %38, %39 : vector<8x1x32xf32>
    %41 = arith.mulf %37, %9 : vector<8x1x32xf32>
    %42 = arith.mulf %40, %11 : vector<8x1x32xf32>
    %43 = arith.subf %41, %42 : vector<8x1x32xf32>
    %44 = arith.mulf %37, %11 : vector<8x1x32xf32>
    %45 = arith.mulf %40, %9 : vector<8x1x32xf32>
    %46 = arith.addf %44, %45 : vector<8x1x32xf32>
    %47 = arith.mulf %43, %9 : vector<8x1x32xf32>
    %48 = arith.mulf %46, %11 : vector<8x1x32xf32>
    %49 = arith.subf %47, %48 : vector<8x1x32xf32>
    %50 = arith.mulf %43, %11 : vector<8x1x32xf32>
    %51 = arith.mulf %46, %9 : vector<8x1x32xf32>
    %52 = arith.addf %50, %51 : vector<8x1x32xf32>
    %53 = arith.mulf %49, %9 : vector<8x1x32xf32>
    %54 = arith.mulf %52, %11 : vector<8x1x32xf32>
    %55 = arith.subf %53, %54 : vector<8x1x32xf32>
    %56 = arith.mulf %49, %11 : vector<8x1x32xf32>
    %57 = arith.mulf %52, %9 : vector<8x1x32xf32>
    %58 = arith.addf %56, %57 : vector<8x1x32xf32>
    %59 = arith.mulf %55, %9 : vector<8x1x32xf32>
    %60 = arith.mulf %58, %11 : vector<8x1x32xf32>
    %61 = arith.subf %59, %60 : vector<8x1x32xf32>
    %62 = arith.mulf %55, %11 : vector<8x1x32xf32>
    %63 = arith.mulf %58, %9 : vector<8x1x32xf32>
    %64 = arith.addf %62, %63 : vector<8x1x32xf32>
    %65 = arith.mulf %61, %9 : vector<8x1x32xf32>
    %66 = arith.mulf %64, %11 : vector<8x1x32xf32>
    %67 = arith.subf %65, %66 : vector<8x1x32xf32>
    %68 = arith.mulf %61, %11 : vector<8x1x32xf32>
    %69 = arith.mulf %64, %9 : vector<8x1x32xf32>
    %70 = arith.addf %68, %69 : vector<8x1x32xf32>
    %71 = tpu.concatenate %25, %31, %37, %43, %49, %55, %61, %67 in 1 : vector<8x1x32xf32>, vector<8x1x32xf32>, vector<8x1x32xf32>, vector<8x1x32xf32>, vector<8x1x32xf32>, vector<8x1x32xf32>, vector<8x1x32xf32>, vector<8x1x32xf32> -> vector<8x8x32xf32>
    %72 = tpu.concatenate %28, %34, %40, %46, %52, %58, %64, %70 in 1 : vector<8x1x32xf32>, vector<8x1x32xf32>, vector<8x1x32xf32>, vector<8x1x32xf32>, vector<8x1x32xf32>, vector<8x1x32xf32>, vector<8x1x32xf32>, vector<8x1x32xf32> -> vector<8x8x32xf32>
    %cst = arith.constant 0.000000e+00 : f32
    %73 = vector.broadcast %cst : f32 to vector<8x8x32xf32>
    %74 = arith.subf %73, %72 : vector<8x8x32xf32>
    %75 = tpu.concatenate %71, %74 in 2 : vector<8x8x32xf32>, vector<8x8x32xf32> -> vector<8x8x64xf32>
    %c0_18 = arith.constant 0 : index
    %c0_19 = arith.constant 0 : index
    %c0_20 = arith.constant 0 : index
    %76 = vector.load %arg3[%c0_18, %c0_19, %c0_20] : memref<8x64x128xf32, #tpu.memory_space<vmem>>, vector<8x64x128xf32>
    %cst_21 = arith.constant dense<0.000000e+00> : vector<8x8x128xf32>
    %77 = tpu.matmul %75, %76, %cst_21 {dimension_numbers = #tpu.dot_dimension_numbers<[2], [1], [1], [2], [0, 0, 0, 1, 1, 2], [0], [0]>} : vector<8x8x64xf32>, vector<8x64x128xf32>, vector<8x8x128xf32> -> vector<8x8x128xf32>
    %78 = vector.extract_strided_slice %77 {offsets = [0, 0, 0], sizes = [8, 1, 128], strides = [1, 1, 1]} : vector<8x8x128xf32> to vector<8x1x128xf32>
    %cst_22 = arith.constant 2.000000e+00 : f32
    %79 = vector.broadcast %cst_22 : f32 to vector<8x1x128xf32>
    %80 = arith.mulf %79, %78 : vector<8x1x128xf32>
    %c0_23 = arith.constant 0 : index
    %c0_24 = arith.constant 0 : index
    %c0_25 = arith.constant 0 : index
    %81 = vector.load %arg4[%c0_23, %c0_24, %c0_25] : memref<8x1x128xf32, #tpu.memory_space<vmem>>, vector<8x1x128xf32>
    tpu.vector_store %arg4[%c0_23, %c0_24, %c0_25], %80 {strides = array<i32>} : memref<8x1x128xf32, #tpu.memory_space<vmem>>, vector<8x1x128xf32>,
    return
  }
  func.func @transform_0(%arg0: i32, %arg1: i32) -> (i32, i32, i32, i32) {
    %c0_i32 = arith.constant 0 : i32
    %c0_i32_0 = arith.constant 0 : i32
    %c0_i32_1 = arith.constant 0 : i32
    %c0_i32_2 = arith.constant 0 : i32
    return %c0_i32, %arg0, %c0_i32_0, %c0_i32_1 : i32, i32, i32, i32
  }
  func.func @transform_1(%arg0: i32, %arg1: i32) -> (i32, i32, i32) {
    %c0_i32 = arith.constant 0 : i32
    %c0_i32_0 = arith.constant 0 : i32
    %c0_i32_1 = arith.constant 0 : i32
    return %arg0, %c0_i32, %c0_i32_0 : i32, i32, i32
  }
  func.func @transform_2(%arg0: i32, %arg1: i32) -> (i32, i32, i32) {
    %c0_i32 = arith.constant 0 : i32
    %c0_i32_0 = arith.constant 0 : i32
    return %arg0, %arg1, %c0_i32 : i32, i32, i32
  }
}

</mosaic_0001>

<bundles_post_ra>
// kernel: tpu_custom_call.1
= control target key start
LH: loop header
LB: loop body
LE: loop exit
PB: predicated region body
PF: predicated region fallthrough
CT: control target
= control target key end

     0   :  { %7 = vsyncpa [#allocation3], 0  ;;  %s6069_s0 = inlined_call_operand.hbm [shape: f32[6,8,1,32], index: 0, kind: input, shape index: {}]   ;;  %s6070_s1 = inlined_call_operand.hbm [shape: f32[8,64,128], index: 1, kind: input, shape index: {}]   ;;  %s6071_s2 = inlined_call_operand.hbm [shape: f32[8,1,128], index: 2, kind: output, shape index: {}]  }
   0x1   :  { %8 = vsyncpa [#allocation6], 0 }
   0x2   :  { %9 = vsyncpa [#allocation4], 0  ;;  %s4175_s9 = smov [#allocation2]  }
   0x3   :  { %s15_s10 = sshll.u32 %s4175_s9, 4  ;;  %s16_s10 = int_to_ptr.vmem [resolvable:$true] %s15_s10 }
   0x4   :  { %s4117_s11 = scalar_lea.vmem %s16_s10, 768  ;;  %p4122_p1 = scmp.lt.s32.totalorder %s16_s10, %s16_s10 }
   0x5   :  { %p4118_p0 = scmp.ne.s32.totalorder %s16_s10, %s4117_s11  ;;  %p4123_p2 = scmp.lt.s32.totalorder %s4117_s11, %s4117_s11 }
   0x7   :  { %p4124_p3 = por %p4123_p2, %p4122_p1 }
   0x9   :  { %p4125_p4 = pnand %p4124_p3, %p4118_p0 }
   0xb   :  { %4128 = shalt.err (!%p4125_p4)
}
   0xc   :  { %s4176_s12 = smov 16   ;;  %s4177_s13 = smov 1  }
   0xd   :  { %21 = dma.hbm_to_vmem [thread:$0]  %s6069_s0, 768, %s16_s10, [#allocation3], %s4176_s12, %s4176_s12, %s4177_s13  }
   0xe   :  { %s4178_s16 = smov [#allocation5]  }
   0xf   :  { %s27_s17 = sshll.u32 %s4178_s16, 4  ;;  %s28_s17 = int_to_ptr.vmem [resolvable:$true] %s27_s17 }
  0x10   :  { %s4137_s18 = scalar_lea.vmem %s28_s17, 8192  ;;  %p4142_p6 = scmp.lt.s32.totalorder %s28_s17, %s28_s17 }
  0x11   :  { %p4138_p5 = scmp.ne.s32.totalorder %s28_s17, %s4137_s18  ;;  %p4143_p7 = scmp.lt.s32.totalorder %s4137_s18, %s4137_s18 }
  0x13   :  { %p4144_p8 = por %p4143_p7, %p4142_p6 }
  0x15   :  { %p4145_p9 = pnand %p4144_p8, %p4138_p5 }
  0x17   :  { %4148 = shalt.err (!%p4145_p9)
}
  0x18   :  { %s4179_s19 = smov 128   ;;  %s4180_s20 = smov 8  }
  0x19   :  { %33 = dma.hbm_to_vmem [thread:$0]  %s6070_s1, 8192, %s28_s17, [#allocation6], %s4179_s19, %s4179_s19, %s4180_s20  }
  0x1a   :  { %4169 = dma.done.wait [#allocation3], 768  }
  0x1b   :  { %4170 = vsyncadd [#allocation3], 4294966528 }
  0x1c   :  { %4171 = dma.done.wait [#allocation6], 8192  }
  0x1d   :  { %4172 = vsyncadd [#allocation6], 4294959104  ;;  %v67_v0 = vld [vmem:[#allocation2 + $0x18] sm:$0x1]  ;;  %v68_v2 = vld [vmem:[#allocation2 + $0x19] sm:$0x1] }
  0x1e   :  { %v4215_v1 = vmul.f32 0.0, %v67_v0  ;;  %v4219_v5 = vmul.f32 0.0, %v68_v2  ;;  %v69_v17 = vld [vmem:[#allocation2 + $0x1a] sm:$0x1]  ;;  %v6085_v26 = vmov 683565275  }
  0x1f   :  { %v4231_v24 = vmul.f32 0.0, %v69_v17  ;;  %v6074_v28 = vmov 2475754826   ;;  %v6072_v30 = vmov 2131351028   ;;  %s4187_s0 = smov 32  }
  0x20   :  { %v128_v3 = vand.u32 2147483647, %v4215_v1  ;;  %v131_v4 = vand.u32 2139095040, %v4215_v1  ;;  %v231_v8 = vand.u32 2147483647, %v4219_v5  ;;  %v234_v9 = vand.u32 2139095040, %v4219_v5 }
  0x21   :  { %v6076_v32 = vmov 2102212464   ;;  %v6081_v34 = vmov 920167782   ;;  %v6079_v41 = vmov 1326507024  }
  0x22   :  { %v132_v6 = vshrl.u32 %v131_v4, 23  ;;  %v135_v7 = vand.u32 8388607, %v128_v3  ;;  %v235_v11 = vshrl.u32 %v234_v9, 23  ;;  %v238_v12 = vand.u32 8388607, %v231_v8 }
  0x23   :  { %vm130_vm13 = vcmp.lt.s32.totalorder %v4215_v1, 0  ;;  %vm4308_vm14 = vcmp.le.f32.partialorder %v128_v3, 0.7853982  ;;  %vm233_vm15 = vcmp.lt.s32.totalorder %v4219_v5, 0  ;;  %s4190_s1 = smov [#allocation7]  }
  0x24   :  { %v3707_v10 = vadd.s32 4294967169, %v132_v6  ;;  %v136_v14 = vor.u32 8388608, %v135_v7  ;;  %v3711_v15 = vadd.s32 4294967169, %v235_v11  ;;  %v239_v16 = vor.u32 8388608, %v238_v12  ;;  %s3694_s23 = sshll.u32 %s4190_s1, 4  ;;  %s3695_s23 = int_to_ptr.vmem [resolvable:$true] %s3694_s23 }
  0x25   :  { %s4149_s24 = scalar_lea.vmem %s3695_s23, 128  ;;  %p4154_p11 = scmp.lt.s32.totalorder %s3695_s23, %s3695_s23 }
  0x26   :  { %v138_v13 = vadd.s32 1, %v3707_v10  ;;  %v241_v19 = vadd.s32 1, %v3711_v15  ;;  %v4227_v22 = vshll.u32 %v136_v14, 8  ;;  %v4229_v23 = vshll.u32 %v239_v16, 8  ;;  %p4150_p10 = scmp.ne.s32.totalorder %s3695_s23, %s4149_s24  ;;  %p4155_p12 = scmp.lt.s32.totalorder %s4149_s24, %s4149_s24 }
  0x28   :  { %vm139_vm0 = vcmp.gt.s32.totalorder %v138_v13, 0  ;;  %vm242_vm1 = vcmp.gt.s32.totalorder %v241_v19, 0  ;;  %p4156_p13 = por %p4155_p12, %p4154_p11 }
  0x29   :  { %v140_v18 = vsel %vm139_vm0, %v138_v13, 0  ;;  %v243_v46 = vsel %vm242_vm1, %v241_v19, 0 }
  0x2a   :  { %v141_v20 = vshrl.u32 %v140_v18, 5  ;;  %v142_v21 = vand.u32 31, %v140_v18  ;;  %v244_v49 = vshrl.u32 %v243_v46, 5  ;;  %v245_v50 = vand.u32 31, %v243_v46  ;;  %p4157_p0 = pnand %p4156_p13, %p4150_p10 }
  0x2c   :  { %v143_v25 = vsub.s32 32, %v142_v21  ;;  %v145_v27 = vshll.u32 %v6085_v26, %v142_v21  ;;  %v148_v29 = vshll.u32 %v6074_v28, %v142_v21  ;;  %v151_v31 = vshll.u32 %v6072_v30, %v142_v21 }
  0x2d   :  { %v154_v33 = vshll.u32 %v6076_v32, %v142_v21  ;;  %v157_v35 = vshll.u32 %v6081_v34, %v142_v21  ;;  %vm160_vm2 = vcmp.lt.s32.totalorder %v141_v20, 1  ;;  %vm161_vm3 = vcmp.lt.s32.totalorder %v141_v20, 2 }
  0x2e   :  { %v144_v36 = vshrl.u32 %v6085_v26, %v143_v25  ;;  %v146_v37 = vshrl.u32 %v6074_v28, %v143_v25  ;;  %v149_v38 = vshrl.u32 %v6072_v30, %v143_v25  ;;  %v152_v39 = vshrl.u32 %v6076_v32, %v143_v25 }
  0x2f   :  { %v155_v40 = vshrl.u32 %v6081_v34, %v143_v25  ;;  %v158_v42 = vshrl.u32 %v6079_v41, %v143_v25  ;;  %vm162_vm4 = vcmp.lt.s32.totalorder %v141_v20, 3  ;;  %vm163_vm5 = vcmp.lt.s32.totalorder %v141_v20, 4 }
  0x30   :  { %v147_v43 = vor.u32 %v146_v37, %v145_v27  ;;  %v150_v44 = vor.u32 %v149_v38, %v148_v29  ;;  %v153_v45 = vor.u32 %v152_v39, %v151_v31  ;;  %v246_v58 = vsub.s32 32, %v245_v50 }
  0x31   :  { %v156_v47 = vor.u32 %v155_v40, %v154_v33  ;;  %v159_v48 = vor.u32 %v158_v42, %v157_v35  ;;  %v248_v62 = vshll.u32 %v6085_v26, %v245_v50  ;;  %v251_v12 = vshll.u32 %v6074_v28, %v245_v50 }
  0x32   :  { %v164_v51 = vsel %vm160_vm2, %v144_v36, %v147_v43  ;;  %v165_v52 = vsel %vm163_vm5, %v153_v45, 2102212464  ;;  %v168_v53 = vsel %vm160_vm2, %v147_v43, %v150_v44  ;;  %v172_v54 = vsel %vm160_vm2, %v150_v44, %v153_v45 }
  0x33   :  { %v166_v55 = vsel %vm162_vm4, %v150_v44, %v165_v52  ;;  %v169_v56 = vsel %vm163_vm5, %v156_v47, 920167782  ;;  %v173_v57 = vsel %vm163_vm5, %v159_v48, 1326507024  ;;  %v247_v4 = vshrl.u32 %v6085_v26, %v246_v58 }
  0x34   :  { %v167_v59 = vsel %vm161_vm3, %v164_v51, %v166_v55  ;;  %v170_v60 = vsel %vm162_vm4, %v153_v45, %v169_v56  ;;  %v174_v61 = vsel %vm162_vm4, %v156_v47, %v173_v57  ;;  %v249_v11 = vshrl.u32 %v6074_v28, %v246_v58  ;;  %v58_v57 = vld [vmem:[#allocation2 + $0x10] sm:$0x1] }
  0x35   :  { %v171_v63 = vsel %vm161_vm3, %v168_v53, %v170_v60  ;;  %v175_v0 = vsel %vm161_vm3, %v172_v54, %v174_v61  ;;  %v183_v2 = vmul.u32 %v4227_v22, %v167_v59  ;;  %v252_v13 = vshrl.u32 %v6072_v30, %v246_v58 }
  0x36   :  { %v4258_v6 = vmul.u32.u64.low %v4227_v22, %v175_v0  ;;  %v4259_v7 = vmul.u32.u64.high %v4227_v22, %v175_v0, %v4258_v6  ;;  %v4262_v9 = vmul.u32.u64.low %v4227_v22, %v171_v63  ;;  %v4263_v10 = vmul.u32.u64.high %v4227_v22, %v171_v63, %v4262_v9 }
  0x37   :  { %v254_v14 = vshll.u32 %v6072_v30, %v245_v50  ;;  %v255_v15 = vshrl.u32 %v6076_v32, %v246_v58  ;;  %v257_v16 = vshll.u32 %v6076_v32, %v245_v50  ;;  %v258_v17 = vshrl.u32 %v6081_v34, %v246_v58  ;;  %v59_v6 = vld [vmem:[#allocation2 + $0x11] sm:$0x1] }
  0x38   :  { %v260_v18 = vshll.u32 %v6081_v34, %v245_v50  ;;  %v250_v19 = vor.u32 %v249_v11, %v248_v62  ;;  %v253_v20 = vor.u32 %v252_v13, %v251_v12  ;;  %v261_v21 = vshrl.u32 %v6079_v41, %v246_v58 }
  0x39   :  { %vm263_vm6 = vcmp.lt.s32.totalorder %v244_v49, 1  ;;  %vm185_vm7 = vc.u32 %v4259_v7, %v4262_v9  ;;  %v186_v22 = vadd.s32 1, %v4263_v10  ;;  %v256_v25 = vor.u32 %v255_v15, %v254_v14 }
  0x3a   :  { %v337_v27 = vand.u32 2139095040, %v4231_v24  ;;  %v259_v29 = vor.u32 %v258_v17, %v257_v16  ;;  %v262_v31 = vor.u32 %v261_v21, %v260_v18  ;;  %vm264_vm8 = vcmp.lt.s32.totalorder %v244_v49, 2 }
  0x3b   :  { %vm265_vm9 = vcmp.lt.s32.totalorder %v244_v49, 3  ;;  %v187_v33 = vsel %vm185_vm7, %v186_v22, %v4263_v10  ;;  %vm266_vm10 = vcmp.lt.s32.totalorder %v244_v49, 4  ;;  %v267_v35 = vsel %vm263_vm6, %v247_v4, %v250_v19 }
  0x3c   :  { %v271_v36 = vsel %vm263_vm6, %v250_v19, %v253_v20  ;;  %v188_v37 = vadd.s32 %v187_v33, %v183_v2  ;;  %v268_v38 = vsel %vm266_vm10, %v256_v25, 2102212464  ;;  %v272_v39 = vsel %vm266_vm10, %v259_v29, 920167782  ;;  %v70_v2 = vld [vmem:[#allocation2 + $0x1b] sm:$0x1] }
  0x3d   :  { %v275_v40 = vsel %vm263_vm6, %v253_v20, %v256_v25  ;;  %v269_v42 = vsel %vm265_vm9, %v253_v20, %v268_v38  ;;  %v273_v43 = vsel %vm265_vm9, %v256_v25, %v272_v39  ;;  %v276_v44 = vsel %vm266_vm10, %v262_v31, 1326507024 }
  0x3e   :  { %v189_v45 = vadd.s32 536870912, %v188_v37  ;;  %v274_v46 = vsel %vm264_vm8, %v271_v36, %v273_v43  ;;  %v277_v47 = vsel %vm265_vm9, %v259_v29, %v276_v44  ;;  %v270_v48 = vsel %vm264_vm8, %v267_v35, %v269_v42 }
  0x3f   :  { %v278_v50 = vsel %vm264_vm8, %v275_v40, %v277_v47  ;;  %v4287_v51 = vmul.u32.u64.low %v4229_v23, %v274_v46  ;;  %v4288_v52 = vmul.u32.u64.high %v4229_v23, %v274_v46, %v4287_v51  ;;  %v338_v56 = vshrl.u32 %v337_v27, 23 }
  0x40   :  { %v190_v53 = vshrl.u32 %v189_v45, 30  ;;  %v4291_v54 = vmul.u32.u64.low %v4229_v23, %v278_v50  ;;  %v4292_v55 = vmul.u32.u64.high %v4229_v23, %v278_v50, %v4291_v54  ;;  %v286_v59 = vmul.u32 %v4229_v23, %v270_v48 }
  0x41   :  { %v334_v60 = vand.u32 2147483647, %v4231_v24  ;;  %v3715_v61 = vadd.s32 4294967169, %v338_v56  ;;  %v2192_v62 = vlaneseq  ;;  %v289_v49 = vadd.s32 1, %v4288_v52 }
  0x42   :  { %v191_v58 = vshll.u32 %v190_v53, 30  ;;  %v96_v63 = vmul.f32 0.0, %v58_v57  ;;  %vm288_vm11 = vc.u32 %v4292_v55, %v4287_v51  ;;  %v214_v4 = vsub.s32 4, %v190_v53 }
  0x43   :  { %v290_v10 = vsel %vm288_vm11, %v289_v49, %v4288_v52  ;;  %v344_v11 = vadd.s32 1, %v3715_v61  ;;  %v341_v23 = vand.u32 8388607, %v334_v60  ;;  %v2193_v14 = vshrl.u32 %v2192_v62, 7 }
  0x44   :  { %v192_v0 = vsub.s32 %v188_v37, %v191_v58  ;;  %v291_v13 = vadd.s32 %v290_v10, %v286_v59  ;;  %v4301_v15 = vmul.f32 0.0, %v70_v2  ;;  %v112_v16 = vmul.f32 1.442695, %v96_v63 }
  0x45   :  { %vm345_vm12 = vcmp.gt.s32.totalorder %v344_v11, 0  ;;  %v97_v18 = vmul.f32 0.0, %v59_v6  ;;  %v215_v19 = vsel %vm130_vm13, %v214_v4, %v190_v53  ;;  %v342_v25 = vor.u32 8388608, %v341_v23 }
  0x46   :  { %v194_v12 = vsub.s32 0, %v192_v0  ;;  %v292_v20 = vadd.s32 536870912, %v291_v13  ;;  %v346_v21 = vsel %vm345_vm12, %v344_v11, 0  ;;  %v4312_v31 = vsub.s32 0, %v2193_v14 }
  0x47   :  { %v348_v27 = vand.u32 31, %v346_v21  ;;  %v440_v35 = vand.u32 2139095040, %v4301_v15  ;;  %4051 = vpow2.f32 %v112_v16  ;;  %v4317_v37 = vsel %vm4308_vm14, 0, %v215_v19 }
  0x48   :  { %v3708_v17 = vmin.u32 %v194_v12, %v192_v0  ;;  %v293_v33 = vshrl.u32 %v292_v20, 30  ;;  %v4319_v38 = vmul.f32 1.442695, %v97_v18  ;;  %v184_v39 = vadd.s32 %v4262_v9, %v4259_v7 }
  0x49   :  { %v437_v40 = vand.u32 2147483647, %v4301_v15  ;;  %v287_v42 = vadd.s32 %v4287_v51, %v4292_v55  ;;  %v349_v43 = vsub.s32 32, %v348_v27  ;;  %v4326_v44 = vshll.u32 %v342_v25, 8 }
  0x4a   :  { %v196_v22 = vclz %v3708_v17  ;;  %v294_v3 = vshll.u32 %v293_v33, 30  ;;  %v4329_v46 = vadd.s32 3, %v4317_v37  ;;  %v4333_v48 = vshrl.u32 %v440_v35, 23 }
  0x4b   :  { %v4335_v52 = vshrl.u32 %v346_v21, 5  ;;  %v317_v54 = vsub.s32 4, %v293_v33  ;;  %v351_v51 = vshll.u32 %v6085_v26, %v348_v27  ;;  %v354_v55 = vshll.u32 %v6074_v28, %v348_v27 }
  0x4c   :  { %v3709_v36 = vadd.s32 4294967294, %v196_v22  ;;  %v4331_v47 = vsub.s32 %v291_v13, %v294_v3  ;;  %v352_v58 = vshrl.u32 %v6074_v28, %v349_v43  ;;  %v355_v59 = vshrl.u32 %v6072_v30, %v349_v43 }
  0x4d   :  { %v357_v62 = vshll.u32 %v6072_v30, %v348_v27  ;;  %v358_v49 = vshrl.u32 %v6076_v32, %v349_v43  ;;  %v360_v63 = vshll.u32 %v6076_v32, %v348_v27  ;;  %v350_v4 = vshrl.u32 %v6085_v26, %v349_v43 }
  0x4e   :  { %vm3710_vm0 = vcmp.lt.s32.totalorder %v3709_v36, 0  ;;  %v297_v53 = vsub.s32 0, %v4331_v47  ;;  %v361_v6 = vshrl.u32 %v6081_v34, %v349_v43  ;;  %v318_v11 = vsel %vm233_vm15, %v317_v54, %v293_v33 }
  0x4f   :  { %v199_v45 = vsel %vm3710_vm0, 0, %v3709_v36  ;;  %v363_v12 = vshll.u32 %v6081_v34, %v348_v27  ;;  %v364_v13 = vshrl.u32 %v6079_v41, %v349_v43  ;;  %v353_v16 = vor.u32 %v352_v58, %v351_v51 }
  0x50   :  { %v200_v7 = vsub.s32 32, %v199_v45  ;;  %v201_v9 = vshll.u32 %v192_v0, %v199_v45  ;;  %v204_v50 = vsub.s32 4294967266, %v199_v45  ;;  %v3712_v61 = vmin.u32 %v297_v53, %v4331_v47 }
  0x51   :  { %v356_v17 = vor.u32 %v355_v59, %v354_v55  ;;  %v359_v19 = vor.u32 %v358_v49, %v357_v62  ;;  %v362_v20 = vor.u32 %v361_v6, %v360_v63  ;;  %vm366_vm1 = vcmp.lt.s32.totalorder %v4335_v52, 1  ;;  %v60_v59 = vld [vmem:[#allocation2 + $0x12] sm:$0x1] }
  0x52   :  { %v202_v56 = vshrl.u32 %v184_v39, %v200_v7  ;;  %v205_v57 = vadd.s32 127, %v204_v50  ;;  %v299_v10 = vclz %v3712_v61  ;;  %v365_v22 = vor.u32 %v364_v13, %v363_v12 }
  0x53   :  { %vm367_vm2 = vcmp.lt.s32.totalorder %v4335_v52, 2  ;;  %vm369_vm3 = vcmp.lt.s32.totalorder %v4335_v52, 4  ;;  %vm368_vm5 = vcmp.lt.s32.totalorder %v4335_v52, 3  ;;  %v370_v27 = vsel %vm366_vm1, %v350_v4, %v353_v16 }
  0x54   :  { %v203_v0 = vor.u32 %v202_v56, %v201_v9  ;;  %v206_v2 = vshll.u32 %v205_v57, 23  ;;  %v3713_v18 = vadd.s32 4294967294, %v299_v10  ;;  %v4355_v25 = vpop.eup %4051  ;;  %v371_v33 = vsel %vm369_vm3, %v359_v19, 2102212464 }
  0x55   :  { %v374_v39 = vsel %vm366_vm1, %v353_v16, %v356_v17  ;;  %v375_v3 = vsel %vm369_vm3, %v362_v20, 920167782  ;;  %v372_v9 = vsel %vm368_vm5, %v356_v17, %v371_v33  ;;  %v378_v54 = vsel %vm366_vm1, %v356_v17, %v359_v19  ;;  %v61_v16 = vld [vmem:[#allocation2 + $0x13] sm:$0x1] }
  0x56   :  { %v207_v23 = vor.u32 4788187, %v206_v2  ;;  %v210_v14 = vcvt.s32.f32 %v203_v0  ;;  %vm3714_vm4 = vcmp.lt.s32.totalorder %v3713_v18, 0  ;;  %v376_v53 = vsel %vm368_vm5, %v359_v19, %v375_v3 }
  0x57   :  { %v302_v36 = vsel %vm3714_vm4, 0, %v3713_v18  ;;  %v379_v51 = vsel %vm369_vm3, %v365_v22, 1326507024  ;;  %v377_v57 = vsel %vm367_vm2, %v374_v39, %v376_v53  ;;  %v373_v2 = vsel %vm367_vm2, %v370_v27, %v372_v9 }
  0x58   :  { %v208_v21 = vand.u32 2147483647, %v207_v23  ;;  %v303_v43 = vsub.s32 32, %v302_v36  ;;  %v304_v45 = vshll.u32 %v4331_v47, %v302_v36  ;;  %v307_v7 = vsub.s32 4294967266, %v302_v36 }
  0x59   :  { %v380_v47 = vsel %vm368_vm5, %v362_v20, %v379_v51  ;;  %v4384_v62 = vmul.u32.u64.low %v4326_v44, %v377_v57  ;;  %v4385_v49 = vmul.u32.u64.high %v4326_v44, %v377_v57, %v4384_v62  ;;  %v3719_v10 = vadd.s32 4294967169, %v4333_v48 }
  0x5a   :  { %v211_v35 = vmul.f32 %v210_v14, %v208_v21  ;;  %v305_v55 = vshrl.u32 %v287_v42, %v303_v43  ;;  %v308_v56 = vadd.s32 127, %v307_v7  ;;  %v381_v61 = vsel %vm367_vm2, %v378_v54, %v380_v47 }
  0x5b   :  { %v4393_v4 = vmul.u32.u64.low %v4326_v44, %v381_v61  ;;  %v4394_v6 = vmul.u32.u64.high %v4326_v44, %v381_v61, %v4393_v4  ;;  %v98_v23 = vmul.f32 0.0, %v60_v59  ;;  %vm4399_vm6 = vcmp.le.f32.partialorder %v231_v8, 0.7853982 }
  0x5c   :  { %v212_v50 = vxor.u32 2147483648, %v211_v35  ;;  %v306_v63 = vor.u32 %v305_v55, %v304_v45  ;;  %v309_v0 = vshll.u32 %v308_v56, 23  ;;  %v389_v52 = vmul.u32 %v4326_v44, %v373_v2  ;;  %v71_v44 = vld [vmem:[#allocation2 + $0x1c] sm:$0x1] }
  0x5d   :  { %v392_v14 = vadd.s32 1, %v4385_v49  ;;  %v447_v17 = vadd.s32 1, %v3719_v10  ;;  %v4406_v18 = vand.u32 3, %v4317_v37  ;;  %v320_v19 = vsel %vm4399_vm6, 0, %v318_v11 }
  0x5e   :  { %v213_v58 = vsel %vm130_vm13, %v212_v50, %v211_v35  ;;  %v310_v12 = vor.u32 4788187, %v309_v0  ;;  %v313_v13 = vcvt.s32.f32 %v306_v63  ;;  %v444_v20 = vand.u32 8388607, %v437_v40 }
  0x5f   :  { %v216_v42 = vsel %vm4308_vm14, %v4215_v1, %v213_v58  ;;  %v4413_v8 = vand.u32 3, %v4329_v46  ;;  %vm391_vm7 = vc.u32 %v4394_v6, %v4384_v62  ;;  %vm448_vm8 = vcmp.gt.s32.totalorder %v447_v17, 0 }
  0x60   :  { %4053 = vcosq.f32 %v216_v42  ;;  %v311_v48 = vand.u32 2147483647, %v310_v12  ;;  %v4417_v22 = vmul.f32 1.442695, %v98_v23  ;;  %v393_v37 = vsel %vm391_vm7, %v392_v14, %v4385_v49 }
  0x61   :  { %4055 = vsinq.f32 %v216_v42  ;;  %v449_v27 = vsel %vm448_vm8, %v447_v17, 0  ;;  %v1157_v33 = vadd.s32 3, %v320_v19  ;;  %v394_v11 = vadd.s32 %v393_v37, %v389_v52 }
  0x62   :  { %4057 = vpow2.f32 %v4319_v38  ;;  %v314_v21 = vmul.f32 %v313_v13, %v311_v48  ;;  %v4420_v35 = vmul.f32 0.0, %v61_v16  ;;  %v451_v36 = vand.u32 31, %v449_v27 }
  0x63   :  { %vm222_vm9 = vcmp.lt.s32.totalorder %v4406_v18, 2  ;;  %v445_v39 = vor.u32 8388608, %v444_v20  ;;  %v4423_v38 = vmul.f32 0.0, %v71_v44  ;;  %vm220_vm10 = vweird.f32 %v4215_v1 }
  0x64   :  { %v315_v46 = vxor.u32 2147483648, %v314_v21  ;;  %vm223_vm11 = vcmp.eq.s32.totalorder %v4406_v18, 0  ;;  %vm226_vm12 = vcmp.eq.s32.totalorder %v4406_v18, 2  ;;  %vm1055_vm13 = vcmp.lt.s32.totalorder %v4413_v8, 2 }
  0x65   :  { %v395_v3 = vadd.s32 536870912, %v394_v11  ;;  %vm1056_vm14 = vcmp.eq.s32.totalorder %v4413_v8, 0  ;;  %vm1059_vm0 = vcmp.eq.s32.totalorder %v4413_v8, 2  ;;  %vm336_vm1 = vcmp.lt.s32.totalorder %v4231_v24, 0 }
  0x66   :  { %v316_v43 = vsel %vm233_vm15, %v315_v46, %v314_v21  ;;  %v452_v45 = vsub.s32 32, %v451_v36  ;;  %v4437_v9 = vand.u32 3, %v320_v19  ;;  %v4439_v50 = vand.u32 3, %v1157_v33  ;;  %v40_v33 = vld [vmem:[#allocation2] sm:$0x1] }
  0x67   :  { %v319_v7 = vsel %vm4399_vm6, %v4219_v5, %v316_v43  ;;  %v396_v53 = vshrl.u32 %v395_v3, 30  ;;  %v4442_v54 = vadd.s32 %v4384_v62, %v4394_v6  ;;  %v4444_v51 = vshrl.u32 %v449_v27, 5 }
  0x68   :  { %4059 = vcosq.f32 %v319_v7  ;;  %v4446_v55 = vshll.u32 %v445_v39, 8  ;;  %vm4450_vm15 = vcmp.le.f32.partialorder %v334_v60, 0.7853982  ;;  %v454_v47 = vshll.u32 %v6085_v26, %v451_v36 }
  0x69   :  { %4061 = vsinq.f32 %v319_v7  ;;  %v397_v57 = vshll.u32 %v396_v53, 30  ;;  %v543_v58 = vand.u32 2139095040, %v4423_v38  ;;  %v455_v61 = vshrl.u32 %v6074_v28, %v452_v45 }
  0x6a   :  { %v457_v62 = vshll.u32 %v6074_v28, %v451_v36  ;;  %v460_v49 = vshll.u32 %v6072_v30, %v451_v36  ;;  %v463_v42 = vshll.u32 %v6076_v32, %v451_v36  ;;  %v420_v2 = vsub.s32 4, %v396_v53 }
  0x6b   :  { %v4460_v60 = vsub.s32 %v394_v11, %v397_v57  ;;  %v4463_v4 = vshll.u32 %v6081_v34, %v451_v36  ;;  %v453_v10 = vshrl.u32 %v6085_v26, %v452_v45  ;;  %v458_v12 = vshrl.u32 %v6072_v30, %v452_v45  ;;  %v49_v11 = vld [vmem:[#allocation2 + $0x8] sm:$0x1] }
  0x6c   :  { %v464_v13 = vshrl.u32 %v6081_v34, %v452_v45  ;;  %vm329_vm2 = vcmp.eq.s32.totalorder %v4437_v9, 2  ;;  %v461_v14 = vshrl.u32 %v6076_v32, %v452_v45  ;;  %vm1163_vm3 = vcmp.eq.s32.totalorder %v4439_v50, 2 }
  0x6d   :  { %v4054_v59 = vpop.eup %4053  ;;  %v400_v52 = vsub.s32 0, %v4460_v60  ;;  %v456_v19 = vor.u32 %v455_v61, %v454_v47  ;;  %v4483_v20 = vshrl.u32 %v6079_v41, %v452_v45  ;;  %vm326_vm4 = vcmp.eq.s32.totalorder %v4437_v9, 0  ;;  %v4515_v61 = vld [vmem:[#allocation2 + $0x28] sm:$0x1] }
  0x6e   :  { %v4056_v63 = vpop.eup %4055  ;;  %v227_v0 = vxor.u32 2147483648, %v4054_v59  ;;  %vm1160_vm5 = vcmp.eq.s32.totalorder %v4439_v50, 0  ;;  %v421_v27 = vsel %vm336_vm1, %v420_v2, %v396_v53  ;;  %v459_v46 = vor.u32 %v458_v12, %v457_v62 }
  0x6f   :  { %v224_v6 = vxor.u32 2147483648, %v4056_v63  ;;  %v4475_v16 = vpop.eup %4057  ;;  %v3716_v37 = vmin.u32 %v400_v52, %v4460_v60  ;;  %v4498_v8 = vor.u32 %v464_v13, %v463_v42  ;;  %vm325_vm6 = vcmp.lt.s32.totalorder %v4437_v9, 2 }
  0x70   :  { %v228_v23 = vsel %vm226_vm12, %v227_v0, %v4056_v63  ;;  %v1061_v29 = vsel %vm1059_vm0, %v227_v0, %v4056_v63  ;;  %vm1159_vm7 = vcmp.lt.s32.totalorder %v4439_v50, 2  ;;  %vm469_vm8 = vcmp.lt.s32.totalorder %v4444_v51, 1 }
  0x71   :  { %v225_v17 = vsel %vm223_vm11, %v4054_v59, %v224_v6  ;;  %v1058_v48 = vsel %vm1056_vm14, %v4054_v59, %v224_v6  ;;  %v402_v43 = vclz %v3716_v37  ;;  %v4508_v1 = vsel %vm4450_vm15, 0, %v421_v27  ;;  %v4513_v59 = vld [vmem:[#allocation2 + $0x20] sm:$0x1] }
  0x72   :  { %v229_v44 = vsel %vm222_vm9, %v225_v17, %v228_v23  ;;  %v1062_v21 = vsel %vm1055_vm13, %v1058_v48, %v1061_v29  ;;  %vm323_vm9 = vweird.f32 %v4219_v5  ;;  %v462_v45 = vor.u32 %v461_v14, %v460_v49 }
  0x73   :  { %v230_v36 = vsel %vm220_vm10, nan, %v229_v44  ;;  %v1063_v18 = vsel %vm220_vm10, nan, %v1062_v21  ;;  %v468_v7 = vor.u32 %v4483_v20, %v4463_v4  ;;  %vm472_vm10 = vcmp.lt.s32.totalorder %v4444_v51, 4 }
  0x74   :  { %v952_v39 = vmul.f32 %v4355_v25, %v230_v36  ;;  %v1792_v3 = vmul.f32 %v4355_v25, %v1063_v18  ;;  %vm2520_vm11 = vcmask 1040384   ;;  %v3717_v62 = vadd.s32 4294967294, %v402_v43 }
  0x75   :  { %vm471_vm12 = vcmp.lt.s32.totalorder %v4444_v51, 3  ;;  %v4520_v49 = vsel %vm469_vm8, %v453_v10, %v456_v19  ;;  %v4524_v42 = vsel %vm469_vm8, %v456_v19, %v459_v46  ;;  %v4060_v63 = vpop.eup %4059  ;;  %v474_v6 = vsel %vm472_vm10, %v462_v45, 2102212464 }
  0x76   :  { %v1800_v25 = vmul.f32 %v952_v39, %v40_v33  ;;  %v1808_v53 = vmul.f32 %v1792_v3, %v49_v11  ;;  %v1824_v57 = vmul.f32 %v1792_v3, %v40_v33  ;;  %v1832_v47 = vmul.f32 %v952_v39, %v49_v11  ;;  %v4062_v13 = vpop.eup %4061 }
  0x77   :  { %v478_v12 = vsel %vm472_vm10, %v4498_v8, 920167782  ;;  %v330_v23 = vxor.u32 2147483648, %v4060_v63  ;;  %vm3718_vm13 = vcmp.lt.s32.totalorder %v3717_v62, 0  ;;  %v475_v10 = vsel %vm471_vm12, %v459_v46, %v474_v6 }
  0x78   :  { %v4526_v0 = vsub.f32 %v1800_v25, %v1808_v53  ;;  %v1840_v2 = vadd.f32 %v1832_v47, %v1824_v57  ;;  %v4537_v29 = vsel %vm469_vm8, %v459_v46, %v462_v45  ;;  %vm2529_vm14 = vcmask 1041408  }
  0x79   :  { %v327_v19 = vxor.u32 2147483648, %v4062_v13  ;;  %v331_v44 = vsel %vm329_vm2, %v330_v23, %v4062_v13  ;;  %v405_v21 = vsel %vm3718_vm13, 0, %v3717_v62  ;;  %v4549_v37 = vsel %vm471_vm12, %v462_v45, %v478_v12  ;;  %v41_v12 = vld [vmem:[#allocation2 + $0x1] sm:$0x1] }
  0x7a   :  { %v1848_v52 = vmul.f32 %v4526_v0, %v4513_v59  ;;  %v1856_v14 = vmul.f32 %v1840_v2, %v4515_v61  ;;  %v1872_v17 = vmul.f32 %v4526_v0, %v4515_v61  ;;  %v1880_v48 = vmul.f32 %v1840_v2, %v4513_v59 }
  0x7b   :  { %v1165_v11 = vsel %vm1163_vm3, %v330_v23, %v4062_v13  ;;  %v406_v36 = vsub.s32 32, %v405_v21  ;;  %vm470_vm0 = vcmp.lt.s32.totalorder %v4444_v51, 2  ;;  %v328_v18 = vsel %vm326_vm4, %v4060_v63, %v327_v19  ;;  %v50_v13 = vld [vmem:[#allocation2 + $0x9] sm:$0x1] }
  0x7c   :  { %v4551_v27 = vsub.f32 %v1848_v52, %v1856_v14  ;;  %v1888_v33 = vadd.f32 %v1880_v48, %v1872_v17  ;;  %v1162_v46 = vsel %vm1160_vm5, %v4060_v63, %v327_v19  ;;  %v407_v39 = vshll.u32 %v4460_v60, %v405_v21 }
  0x7d   :  { %v410_v3 = vsub.s32 4294967266, %v405_v21  ;;  %vm2538_vm2 = vcmask 1042432   ;;  %v332_v47 = vsel %vm325_vm6, %v328_v18, %v331_v44  ;;  %v1166_v60 = vsel %vm1159_vm7, %v1162_v46, %v1165_v11  ;;  %v4595_v18 = vld [vmem:[#allocation2 + $0x29] sm:$0x1] }
  0x7e   :  { %v1896_v43 = vmul.f32 %v4551_v27, %v4513_v59  ;;  %v1904_v45 = vmul.f32 %v1888_v33, %v4515_v61  ;;  %v1920_v25 = vmul.f32 %v4551_v27, %v4515_v61  ;;  %v1928_v53 = vmul.f32 %v1888_v33, %v4513_v59 }
  0x7f   :  { %v2594_v57 = vrot.slane %v1888_v33, %v4312_v31  ;;  %v408_v62 = vshrl.u32 %v4442_v54, %v406_v36  ;;  %v333_v23 = vsel %vm323_vm9, nan, %v332_v47  ;;  %v1167_v52 = vsel %vm323_vm9, nan, %v1166_v60  ;;  %v4593_v36 = vld [vmem:[#allocation2 + $0x21] sm:$0x1] }
  0x80   :  { %v4573_v63 = vsub.f32 %v1896_v43, %v1904_v45  ;;  %v1936_v6 = vadd.f32 %v1928_v53, %v1920_v25  ;;  %v953_v9 = vmul.f32 %v4475_v16, %v333_v23  ;;  %v1793_v50 = vmul.f32 %v4475_v16, %v1167_v52 }
  0x81   :  { %v2919_v14 = vsel %vm2520_vm11, %v1840_v2, %v2594_v57  ;;  %v4582_v17 = vor.u32 %v408_v62, %v407_v39  ;;  %vm2547_vm3 = vcmask 1043456   ;;  %v411_v39 = vadd.s32 127, %v410_v3 }
  0x82   :  { %v1944_v54 = vmul.f32 %v4573_v63, %v4513_v59  ;;  %v1952_v48 = vmul.f32 %v1936_v6, %v4515_v61  ;;  %v1968_v19 = vmul.f32 %v4573_v63, %v4515_v61  ;;  %v1976_v44 = vmul.f32 %v1936_v6, %v4513_v59 }
  0x83   :  { %v2642_v5 = vrot.slane %v1936_v6, %v4312_v31  ;;  %v1801_v2 = vmul.f32 %v953_v9, %v41_v12  ;;  %v1809_v21 = vmul.f32 %v1793_v50, %v50_v13  ;;  %v1825_v33 = vmul.f32 %v1793_v50, %v41_v12 }
  0x84   :  { %v4591_v11 = vsub.f32 %v1944_v54, %v1952_v48  ;;  %v1984_v16 = vadd.f32 %v1976_v44, %v1968_v19  ;;  %v1833_v46 = vmul.f32 %v953_v9, %v50_v13  ;;  %v416_v25 = vcvt.s32.f32 %v4582_v17 }
  0x85   :  { %v2927_v43 = vsel %vm2529_vm14, %v2919_v14, %v2642_v5  ;;  %v4598_v45 = vsub.f32 %v1801_v2, %v1809_v21  ;;  %v4604_v53 = vsel %vm470_vm0, %v4520_v49, %v475_v10  ;;  %vm2556_vm4 = vcmask 1044480  }
  0x86   :  { %v1992_v57 = vmul.f32 %v4591_v11, %v4513_v59  ;;  %v2000_v47 = vmul.f32 %v1984_v16, %v4515_v61  ;;  %v2016_v60 = vmul.f32 %v4591_v11, %v4515_v61  ;;  %v2024_v3 = vmul.f32 %v1984_v16, %v4513_v59 }
  0x87   :  { %v2690_v62 = vrot.slane %v1984_v16, %v4312_v31  ;;  %v1841_v6 = vadd.f32 %v1833_v46, %v1825_v33  ;;  %v1849_v12 = vmul.f32 %v4598_v45, %v4593_v36  ;;  %v1873_v49 = vmul.f32 %v4598_v45, %v4595_v18 }
  0x88   :  { %v4617_v10 = vsub.f32 %v1992_v57, %v2000_v47  ;;  %v2032_v13 = vadd.f32 %v2024_v3, %v2016_v60  ;;  %v412_v23 = vshll.u32 %v411_v39, 23  ;;  %v482_v52 = vsel %vm472_vm10, %v468_v7, 1326507024 }
  0x89   :  { %v2935_v14 = vsel %vm2538_vm2, %v2927_v43, %v2690_v62  ;;  %v1857_v9 = vmul.f32 %v1841_v6, %v4595_v18  ;;  %v1881_v50 = vmul.f32 %v1841_v6, %v4593_v36  ;;  %v483_v17 = vsel %vm471_vm12, %v4498_v8, %v482_v52 }
  0x8a   :  { %v2040_v54 = vmul.f32 %v4617_v10, %v4513_v59  ;;  %v2048_v48 = vmul.f32 %v2032_v13, %v4515_v61  ;;  %v2064_v4 = vmul.f32 %v4617_v10, %v4515_v61  ;;  %v2072_v20 = vmul.f32 %v2032_v13, %v4513_v59 }
  0x8b   :  { %vm2565_vm5 = vcmask 1045504   ;;  %v2738_v7 = vrot.slane %v2032_v13, %v4312_v31  ;;  %v4637_v19 = vsub.f32 %v1849_v12, %v1857_v9  ;;  %v1889_v44 = vadd.f32 %v1881_v50, %v1873_v49 }
  0x8c   :  { %v480_v8 = vsel %vm470_vm0, %v4524_v42, %v4549_v37  ;;  %v4643_v5 = vsub.f32 %v2040_v54, %v2048_v48  ;;  %v2080_v2 = vadd.f32 %v2072_v20, %v2064_v4  ;;  %v413_v21 = vor.u32 4788187, %v412_v23 }
  0x8d   :  { %v484_v33 = vsel %vm470_vm0, %v4537_v29, %v483_v17  ;;  %vm2574_vm6 = vcmask 1046528   ;;  %v2943_v16 = vsel %vm2547_vm3, %v2935_v14, %v2738_v7  ;;  %v1897_v46 = vmul.f32 %v4637_v19, %v4593_v36 }
  0x8e   :  { %v1905_v39 = vmul.f32 %v1889_v44, %v4595_v18  ;;  %v1921_v43 = vmul.f32 %v4637_v19, %v4595_v18  ;;  %v2088_v42 = vmul.f32 %v4643_v5, %v4513_v59  ;;  %v2096_v37 = vmul.f32 %v2080_v2, %v4515_v61 }
  0x8f   :  { %v2112_v51 = vmul.f32 %v4643_v5, %v4515_v61  ;;  %v2120_v29 = vmul.f32 %v2080_v2, %v4513_v59  ;;  %v2786_v57 = vrot.slane %v2080_v2, %v4312_v31  ;;  %v1929_v60 = vmul.f32 %v1889_v44, %v4593_v36 }
  0x90   :  { %v4661_v47 = vsub.f32 %v1897_v46, %v1905_v39  ;;  %v2598_v3 = vrot.slane %v1889_v44, %v4312_v31  ;;  %v4665_v62 = vsub.f32 %v2088_v42, %v2096_v37  ;;  %v414_v49 = vand.u32 2147483647, %v413_v21 }
  0x91   :  { %v4667_v12 = vadd.f32 %v2120_v29, %v2112_v51  ;;  %v492_v13 = vmul.u32 %v4446_v55, %v4604_v53  ;;  %v2951_v23 = vsel %vm2556_vm4, %v2943_v16, %v2786_v57  ;;  %v1937_v52 = vadd.f32 %v1929_v60, %v1921_v43 }
  0x92   :  { %v1945_v14 = vmul.f32 %v4661_v47, %v4593_v36  ;;  %v1969_v9 = vmul.f32 %v4661_v47, %v4595_v18  ;;  %v2160_v50 = vmul.f32 %v4665_v62, %v4515_v61  ;;  %v2920_v53 = vsel %vm2520_vm11, %v1841_v6, %v2598_v3 }
  0x93   :  { %v2168_v17 = vmul.f32 %v4667_v12, %v4513_v59  ;;  %v2834_v54 = vrot.slane %v4667_v12, %v4312_v31  ;;  %v1953_v48 = vmul.f32 %v1937_v52, %v4595_v18  ;;  %v1977_v4 = vmul.f32 %v1937_v52, %v4593_v36 }
  0x94   :  { %v2646_v20 = vrot.slane %v1937_v52, %v4312_v31  ;;  %v417_v7 = vmul.f32 %v416_v25, %v414_v49  ;;  %v4687_v2 = vmul.u32.u64.low %v4446_v55, %v484_v33  ;;  %v4688_v21 = vmul.u32.u64.high %v4446_v55, %v484_v33, %v4687_v2 }
  0x95   :  { %v2176_v44 = vadd.f32 %v2168_v17, %v2160_v50  ;;  %v544_v59 = vshrl.u32 %v543_v58, 23  ;;  %v2959_v61 = vsel %vm2565_vm5, %v2951_v23, %v2834_v54  ;;  %v4693_v16 = vsub.f32 %v1945_v14, %v1953_v48 }
  0x96   :  { %v1985_v6 = vadd.f32 %v1977_v4, %v1969_v9  ;;  %v418_v46 = vxor.u32 2147483648, %v417_v7  ;;  %v2928_v43 = vsel %vm2529_vm14, %v2920_v53, %v2646_v20  ;;  %v540_v48 = vand.u32 2147483647, %v4423_v38 }
  0x97   :  { %v2882_v39 = vrot.slane %v2176_v44, %v4312_v31  ;;  %v4698_v25 = vmul.u32.u64.low %v4446_v55, %v480_v8  ;;  %v4699_v42 = vmul.u32.u64.high %v4446_v55, %v480_v8, %v4698_v25  ;;  %v1993_v33 = vmul.f32 %v4693_v16, %v4593_v36 }
  0x98   :  { %v2001_v58 = vmul.f32 %v1985_v6, %v4595_v18  ;;  %v2017_v37 = vmul.f32 %v4693_v16, %v4595_v18  ;;  %v2025_v51 = vmul.f32 %v1985_v6, %v4593_v36  ;;  %v2694_v57 = vrot.slane %v1985_v6, %v4312_v31 }
  0x99   :  { %v2967_v29 = vsel %vm2574_vm6, %v2959_v61, %v2882_v39  ;;  %v419_v60 = vsel %vm336_vm1, %v418_v46, %v417_v7  ;;  %v3723_v55 = vadd.s32 4294967169, %v544_v59  ;;  %vm494_vm7 = vc.u32 %v4688_v21, %v4698_v25 }
  0x9a   :  { %v2975_v8 = vsub.f32 0.0, %v2967_v29  ;;  %v4712_v3 = vsub.f32 %v1993_v33, %v2001_v58  ;;  %v2033_v49 = vadd.f32 %v2025_v51, %v2017_v37  ;;  %v422_v23 = vsel %vm4450_vm15, %v4231_v24, %v419_v60  ;;  %v62_v37 = vld [vmem:[#allocation2 + $0x14] sm:$0x1]  ;;  %v72_v29 = vld [vmem:[#allocation2 + $0x1d] sm:$0x1] }
  0x9b   :  { %v2936_v52 = vsel %vm2538_vm2, %v2928_v43, %v2694_v57  ;;  %4063 = vcosq.f32 %v422_v23  ;;  %v495_v14 = vadd.s32 1, %v4699_v42  ;;  %v550_v44 = vadd.s32 1, %v3723_v55 }
  0x9c   :  { %2991 = vrot.lane.b32.xlu0 %v2975_v8, %s4187_s0  ;;  %v2041_v9 = vmul.f32 %v4712_v3, %v4593_v36  ;;  %v2049_v50 = vmul.f32 %v2033_v49, %v4595_v18  ;;  %v2065_v56 = vmul.f32 %v4712_v3, %v4595_v18  ;;  %v2073_v17 = vmul.f32 %v2033_v49, %v4593_v36 }
  0x9d   :  { %v2742_v54 = vrot.slane %v2033_v49, %v4312_v31  ;;  %4065 = vsinq.f32 %v422_v23  ;;  %v496_v53 = vsel %vm494_vm7, %v495_v14, %v4699_v42  ;;  %v1261_v59 = vadd.s32 3, %v4508_v1 }
  0x9e   :  { %v4731_v4 = vsub.f32 %v2041_v9, %v2049_v50  ;;  %v2081_v20 = vadd.f32 %v2073_v17, %v2065_v56  ;;  %v497_v7 = vadd.s32 %v496_v53, %v492_v13  ;;  %4067 = vpow2.f32 %v4417_v22 }
  0x9f   :  { %v2944_v2 = vsel %vm2547_vm3, %v2936_v52, %v2742_v54  ;;  %v4737_v61 = vmul.f32 1.442695, %v4420_v35  ;;  %v547_v22 = vand.u32 8388607, %v540_v48  ;;  %vm551_vm1 = vcmp.gt.s32.totalorder %v550_v44, 0 }
  0xa0   :  { %v2089_v6 = vmul.f32 %v4731_v4, %v4593_v36  ;;  %v2097_v46 = vmul.f32 %v2081_v20, %v4595_v18  ;;  %v2113_v39 = vmul.f32 %v4731_v4, %v4595_v18  ;;  %v2121_v13 = vmul.f32 %v2081_v20, %v4593_v36 }
  0xa1   :  { %v2790_v43 = vrot.slane %v2081_v20, %v4312_v31  ;;  %v498_v42 = vadd.s32 536870912, %v497_v7  ;;  %v427_v58 = vand.u32 3, %v4508_v1  ;;  %v552_v51 = vsel %vm551_vm1, %v550_v44, 0 }
  0xa2   :  { %v4748_v33 = vsub.f32 %v2089_v6, %v2097_v46  ;;  %v4750_v35 = vadd.f32 %v2121_v13, %v2113_v39  ;;  %v1262_v60 = vand.u32 3, %v1261_v59  ;;  %vm439_vm15 = vcmp.lt.s32.totalorder %v4301_v15, 0 }
  0xa3   :  { %v2952_v57 = vsel %vm2556_vm4, %v2944_v2, %v2790_v43  ;;  %v499_v55 = vshrl.u32 %v498_v42, 30  ;;  %vm426_vm8 = vweird.f32 %v4231_v24  ;;  %v554_v1 = vand.u32 31, %v552_v51  ;;  %v4804_v24 = vld [vmem:[#allocation2 + $0x22] sm:$0x1] }
  0xa4   :  { %v2161_v8 = vmul.f32 %v4748_v33, %v4595_v18  ;;  %v2169_v49 = vmul.f32 %v4750_v35, %v4593_v36  ;;  %v2838_v23 = vrot.slane %v4750_v35, %v4312_v31  ;;  %v4762_v14 = vmul.f32 0.0, %v62_v37 }
  0xa5   :  { %v500_v52 = vshll.u32 %v499_v55, 30  ;;  %v548_v9 = vor.u32 8388608, %v547_v22  ;;  %v4764_v50 = vmul.f32 0.0, %v72_v29  ;;  %vm428_vm9 = vcmp.lt.s32.totalorder %v427_v58, 2 }
  0xa6   :  { %v2177_v56 = vadd.f32 %v2169_v49, %v2161_v8  ;;  %vm429_vm10 = vcmp.eq.s32.totalorder %v427_v58, 0  ;;  %vm432_vm12 = vcmp.eq.s32.totalorder %v427_v58, 2  ;;  %v2960_v18 = vsel %vm2565_vm5, %v2952_v57, %v2838_v23 }
  0xa7   :  { %vm1263_vm13 = vcmp.lt.s32.totalorder %v1262_v60, 2  ;;  %vm1264_vm0 = vcmp.eq.s32.totalorder %v1262_v60, 0  ;;  %v4767_v36 = vsub.s32 %v497_v7, %v500_v52  ;;  %vm1267_vm7 = vcmp.eq.s32.totalorder %v1262_v60, 2 }
  0xa8   :  { %v4064_v17 = vpop.eup %4063  ;;  %v2886_v54 = vrot.slane %v2177_v56, %v4312_v31  ;;  %v523_v53 = vsub.s32 4, %v499_v55  ;;  %v555_v20 = vsub.s32 32, %v554_v1  ;;  %v493_v2 = vadd.s32 %v4698_v25, %v4688_v21 }
  0xa9   :  { %v433_v44 = vxor.u32 2147483648, %v4064_v17  ;;  %v503_v59 = vsub.s32 0, %v4767_v36  ;;  %v4773_v6 = vshll.u32 %v548_v9, 8  ;;  %v4776_v13 = vshrl.u32 %v552_v51, 5 }
  0xaa   :  { %v4066_v46 = vpop.eup %4065  ;;  %v2968_v39 = vsel %vm2574_vm6, %v2960_v18, %v2886_v54  ;;  %v557_v7 = vshll.u32 %v6085_v26, %v554_v1  ;;  %v560_v43 = vshll.u32 %v6074_v28, %v554_v1  ;;  %v4784_v25 = vsel %vm439_vm15, %v523_v53, %v499_v55  ;;  %v42_v53 = vld [vmem:[#allocation2 + $0x2] sm:$0x1] }
  0xab   :  { %v2976_v42 = vsub.f32 0.0, %v2968_v39  ;;  %v430_v22 = vxor.u32 2147483648, %v4066_v46  ;;  %v434_v37 = vsel %vm432_vm12, %v433_v44, %v4066_v46  ;;  %v1269_v29 = vsel %vm1267_vm7, %v433_v44, %v4066_v46  ;;  %v4068_v57 = vpop.eup %4067  ;;  %v51_v44 = vld [vmem:[#allocation2 + $0xa] sm:$0x1] }
  0xac   :  { %v3720_v21 = vmin.u32 %v503_v59, %v4767_v36  ;;  %v558_v8 = vshrl.u32 %v6074_v28, %v555_v20  ;;  %v563_v51 = vshll.u32 %v6072_v30, %v554_v1  ;;  %v561_v52 = vshrl.u32 %v6072_v30, %v555_v20 }
  0xad   :  { %2993 = vrot.lane.b32.xlu0 %v2976_v42, %s4187_s0  ;;  %v431_v49 = vsel %vm429_vm10, %v4064_v17, %v430_v22  ;;  %v1266_v23 = vsel %vm1264_vm0, %v4064_v17, %v430_v22  ;;  %v564_v9 = vshrl.u32 %v6076_v32, %v555_v20  ;;  %v556_v54 = vshrl.u32 %v6085_v26, %v555_v20 }
  0xae   :  { %v435_v56 = vsel %vm428_vm9, %v431_v49, %v434_v37  ;;  %v1270_v18 = vsel %vm1263_vm13, %v1266_v23, %v1269_v29  ;;  %v505_v55 = vclz %v3720_v21  ;;  %v566_v17 = vshll.u32 %v6076_v32, %v554_v1 }
  0xaf   :  { %v436_v59 = vsel %vm426_vm8, nan, %v435_v56  ;;  %v1271_v46 = vsel %vm426_vm8, nan, %v1270_v18  ;;  %v567_v39 = vshrl.u32 %v6081_v34, %v555_v20  ;;  %v559_v60 = vor.u32 %v558_v8, %v557_v7  ;;  %v4806_v18 = vld [vmem:[#allocation2 + $0x2a] sm:$0x1] }
  0xb0   :  { %v954_v42 = vmul.f32 %v4068_v57, %v436_v59  ;;  %v1794_v58 = vmul.f32 %v4068_v57, %v1271_v46  ;;  %v3721_v22 = vadd.s32 4294967294, %v505_v55  ;;  %v562_v37 = vor.u32 %v561_v52, %v560_v43 }
  0xb1   :  { %v565_v29 = vor.u32 %v564_v9, %v563_v51  ;;  %v569_v21 = vshll.u32 %v6081_v34, %v554_v1  ;;  %v570_v49 = vshrl.u32 %v6079_v41, %v555_v20  ;;  %v568_v32 = vor.u32 %v567_v39, %v566_v17 }
  0xb2   :  { %v1802_v23 = vmul.f32 %v954_v42, %v42_v53  ;;  %v1810_v30 = vmul.f32 %v1794_v58, %v51_v44  ;;  %v1826_v56 = vmul.f32 %v1794_v58, %v42_v53  ;;  %v1834_v28 = vmul.f32 %v954_v42, %v51_v44 }
  0xb3   :  { %vm3722_vm1 = vcmp.lt.s32.totalorder %v3721_v22, 0  ;;  %v571_v59 = vor.u32 %v570_v49, %v569_v21  ;;  %vm572_vm8 = vcmp.lt.s32.totalorder %v4776_v13, 1  ;;  %vm574_vm9 = vcmp.lt.s32.totalorder %v4776_v13, 3 }
  0xb4   :  { %v4809_v7 = vsub.f32 %v1802_v23, %v1810_v30  ;;  %v1842_v43 = vadd.f32 %v1834_v28, %v1826_v56  ;;  %v508_v57 = vsel %vm3722_vm1, 0, %v3721_v22  ;;  %vm575_vm10 = vcmp.lt.s32.totalorder %v4776_v13, 4 }
  0xb5   :  { %v509_v1 = vsub.s32 32, %v508_v57  ;;  %v510_v20 = vshll.u32 %v4767_v36, %v508_v57  ;;  %v513_v8 = vsub.s32 4294967266, %v508_v57  ;;  %vm573_vm12 = vcmp.lt.s32.totalorder %v4776_v13, 2 }
  0xb6   :  { %6119 = vst [vmem:[#allocation11_spill] sm:$0xff] %v4809_v7  ;;  %v1850_v51 = vmul.f32 %v4809_v7, %v4804_v24  ;;  %v1858_v52 = vmul.f32 %v1842_v43, %v4806_v18  ;;  %v1874_v9 = vmul.f32 %v4809_v7, %v4806_v18  ;;  %v1882_v30 = vmul.f32 %v1842_v43, %v4804_v24 }
  0xb7   :  { %v511_v28 = vshrl.u32 %v493_v2, %v509_v1  ;;  %v514_v55 = vadd.s32 127, %v513_v8  ;;  %v576_v36 = vsel %vm572_vm8, %v556_v54, %v559_v60  ;;  %v577_v46 = vsel %vm575_vm10, %v565_v29, 2102212464 }
  0xb8   :  { %v4823_v53 = vsub.f32 %v1850_v51, %v1858_v52  ;;  %v1890_v44 = vadd.f32 %v1882_v30, %v1874_v9  ;;  %v581_v17 = vsel %vm575_vm10, %v568_v32, 920167782  ;;  %vm4831_vm13 = vcmp.le.f32.partialorder %v437_v40, 0.7853982 }
  0xb9   :  { %v512_v2 = vor.u32 %v511_v28, %v510_v20  ;;  %v515_v42 = vshll.u32 %v514_v55, 23  ;;  %v580_v54 = vsel %vm572_vm8, %v559_v60, %v562_v37  ;;  %v582_v58 = vsel %vm574_vm9, %v565_v29, %v581_v17 }
  0xba   :  { %6120 = vst [vmem:[#allocation12_spill] sm:$0xff] %v4823_v53  ;;  %v1898_v22 = vmul.f32 %v4823_v53, %v4804_v24  ;;  %v1906_v21 = vmul.f32 %v1890_v44, %v4806_v18  ;;  %v1922_v49 = vmul.f32 %v4823_v53, %v4806_v18  ;;  %v1930_v40 = vmul.f32 %v1890_v44, %v4804_v24 }
  0xbb   :  { %v2602_v23 = vrot.slane %v1890_v44, %v4312_v31  ;;  %v516_v56 = vor.u32 4788187, %v515_v42  ;;  %v519_v57 = vcvt.s32.f32 %v512_v2  ;;  %v578_v60 = vsel %vm574_vm9, %v562_v37, %v577_v46 }
  0xbc   :  { %v4848_v1 = vsub.f32 %v1898_v22, %v1906_v21  ;;  %v1938_v20 = vadd.f32 %v1930_v40, %v1922_v49  ;;  %v584_v8 = vsel %vm572_vm8, %v562_v37, %v565_v29  ;;  %v585_v51 = vsel %vm575_vm10, %v571_v59, 1326507024 }
  0xbd   :  { %v2921_v52 = vsel %vm2520_vm11, %v1842_v43, %v2602_v23  ;;  %v517_v9 = vand.u32 2147483647, %v516_v56  ;;  %v583_v30 = vsel %vm573_vm12, %v580_v54, %v582_v58  ;;  %v586_v28 = vsel %vm574_vm9, %v568_v32, %v585_v51 }
  0xbe   :  { %6123 = vst [vmem:[#allocation13_spill] sm:$0xff] %v4848_v1  ;;  %v1946_v55 = vmul.f32 %v4848_v1, %v4804_v24  ;;  %v1954_v44 = vmul.f32 %v1938_v20, %v4806_v18  ;;  %v1970_v37 = vmul.f32 %v4848_v1, %v4806_v18  ;;  %v1978_v29 = vmul.f32 %v1938_v20, %v4804_v24 }
  0xbf   :  { %v2650_v59 = vrot.slane %v1938_v20, %v4312_v31  ;;  %v520_v43 = vmul.f32 %v519_v57, %v517_v9  ;;  %v579_v46 = vsel %vm573_vm12, %v576_v36, %v578_v60  ;;  %v587_v17 = vsel %vm573_vm12, %v584_v8, %v586_v28 }
  0xc0   :  { %v4870_v32 = vsub.f32 %v1946_v55, %v1954_v44  ;;  %v1986_v2 = vadd.f32 %v1978_v29, %v1970_v37  ;;  %v4873_v42 = vmul.u32.u64.low %v4773_v6, %v587_v17  ;;  %v4874_v54 = vmul.u32.u64.high %v4773_v6, %v587_v17, %v4873_v42 }
  0xc1   :  { %v2929_v58 = vsel %vm2529_vm14, %v2921_v52, %v2650_v59  ;;  %v521_v22 = vxor.u32 2147483648, %v520_v43  ;;  %v4878_v21 = vmul.u32.u64.low %v4773_v6, %v583_v30  ;;  %v4879_v49 = vmul.u32.u64.high %v4773_v6, %v583_v30, %v4878_v21 }
  0xc2   :  { %6124 = vst [vmem:[#allocation14_spill] sm:$0xff] %v4870_v32  ;;  %v1994_v36 = vmul.f32 %v4870_v32, %v4804_v24  ;;  %v2002_v13 = vmul.f32 %v1986_v2, %v4806_v18  ;;  %v2018_v40 = vmul.f32 %v4870_v32, %v4806_v18  ;;  %v2026_v23 = vmul.f32 %v1986_v2, %v4804_v24 }
  0xc3   :  { %v2698_v56 = vrot.slane %v1986_v2, %v4312_v31  ;;  %v522_v57 = vsel %vm439_vm15, %v521_v22, %v520_v43  ;;  %v526_v60 = vsel %vm4831_vm13, 0, %v4784_v25  ;;  %v646_v20 = vand.u32 2139095040, %v4764_v50 }
  0xc4   :  { %v4895_v8 = vsub.f32 %v1994_v36, %v2002_v13  ;;  %v2034_v51 = vadd.f32 %v2026_v23, %v2018_v40  ;;  %v525_v52 = vsel %vm4831_vm13, %v4301_v15, %v522_v57  ;;  %v595_v9 = vmul.u32 %v4773_v6, %v579_v46 }
  0xc5   :  { %v2937_v30 = vsel %vm2538_vm2, %v2929_v58, %v2698_v56  ;;  %4069 = vcosq.f32 %v525_v52  ;;  %vm597_vm15 = vc.u32 %v4874_v54, %v4878_v21  ;;  %v598_v28 = vadd.s32 1, %v4879_v49 }
  0xc6   :  { %6125 = vst [vmem:[#allocation15_spill] sm:$0xff] %v4895_v8  ;;  %v2042_v25 = vmul.f32 %v4895_v8, %v4804_v24  ;;  %v2050_v55 = vmul.f32 %v2034_v51, %v4806_v18  ;;  %v2066_v44 = vmul.f32 %v4895_v8, %v4806_v18  ;;  %v2074_v39 = vmul.f32 %v2034_v51, %v4804_v24 }
  0xc7   :  { %v2746_v6 = vrot.slane %v2034_v51, %v4312_v31  ;;  %4071 = vsinq.f32 %v525_v52  ;;  %v599_v37 = vsel %vm597_vm15, %v598_v28, %v4879_v49  ;;  %v647_v29 = vshrl.u32 %v646_v20, 23  ;;  %v63_v28 = vld [vmem:[#allocation2 + $0x15] sm:$0x1] }
  0xc8   :  { %v4913_v59 = vsub.f32 %v2042_v25, %v2050_v55  ;;  %v2082_v43 = vadd.f32 %v2074_v39, %v2066_v44  ;;  %v600_v46 = vadd.s32 %v599_v37, %v595_v9  ;;  %4073 = vpow2.f32 %v4737_v61 }
  0xc9   :  { %v2945_v17 = vsel %vm2547_vm3, %v2937_v30, %v2746_v6  ;;  %v1365_v2 = vadd.s32 3, %v526_v60  ;;  %v3727_v42 = vadd.s32 4294967169, %v647_v29  ;;  %v120_v40 = vmul.f32 1.442695, %v4762_v14 }
  0xca   :  { %6126 = vst [vmem:[#allocation16_spill] sm:$0xff] %v4913_v59  ;;  %v2090_v58 = vmul.f32 %v4913_v59, %v4804_v24  ;;  %v2098_v22 = vmul.f32 %v2082_v43, %v4806_v18  ;;  %v2114_v36 = vmul.f32 %v4913_v59, %v4806_v18  ;;  %v2122_v49 = vmul.f32 %v2082_v43, %v4804_v24 }
  0xcb   :  { %v2794_v13 = vrot.slane %v2082_v43, %v4312_v31  ;;  %v601_v23 = vadd.s32 536870912, %v600_v46  ;;  %v653_v56 = vadd.s32 1, %v3727_v42  ;;  %v530_v20 = vand.u32 3, %v526_v60 }
  0xcc   :  { %v4925_v57 = vsub.f32 %v2090_v58, %v2098_v22  ;;  %v4927_v61 = vadd.f32 %v2122_v49, %v2114_v36  ;;  %v6078_v51 = vand.u32 2147483647, %v4764_v50  ;;  %v1366_v9 = vand.u32 3, %v1365_v2 }
  0xcd   :  { %v2953_v52 = vsel %vm2556_vm4, %v2945_v17, %v2794_v13  ;;  %v602_v30 = vshrl.u32 %v601_v23, 30  ;;  %vm654_vm0 = vcmp.gt.s32.totalorder %v653_v56, 0  ;;  %vm529_vm7 = vweird.f32 %v4301_v15  ;;  %v73_v17 = vld [vmem:[#allocation2 + $0x1e] sm:$0x1] }
  0xce   :  { %6127 = vst [vmem:[#allocation17_spill] sm:$0xff] %v4925_v57  ;;  %v2162_v25 = vmul.f32 %v4925_v57, %v4806_v18  ;;  %v2170_v14 = vmul.f32 %v4927_v61, %v4804_v24  ;;  %v2842_v55 = vrot.slane %v4927_v61, %v4312_v31  ;;  %v655_v60 = vsel %vm654_vm0, %v653_v56, 0  ;;  %v4997_v57 = vld [vmem:[#allocation2 + $0x23] sm:$0x1] }
  0xcf   :  { %4075 = vpow2.f32 %v120_v40  ;;  %vm542_vm1 = vcmp.lt.s32.totalorder %v4423_v38, 0  ;;  %v603_v44 = vshll.u32 %v602_v30, 30  ;;  %v4939_v39 = vand.u32 31, %v655_v60 }
  0xd0   :  { %v2178_v6 = vadd.f32 %v2170_v14, %v2162_v25  ;;  %vm531_vm8 = vcmp.lt.s32.totalorder %v530_v20, 2  ;;  %vm4943_vm9 = vcmp.le.f32.partialorder %v540_v48, 0.7853982  ;;  %v4947_v24 = vmul.f32 0.0, %v63_v28 }
  0xd1   :  { %v650_v37 = vand.u32 8388607, %v6078_v51  ;;  %v2961_v29 = vsel %vm2565_vm5, %v2953_v52, %v2842_v55  ;;  %vm532_vm10 = vcmp.eq.s32.totalorder %v530_v20, 0  ;;  %vm535_vm12 = vcmp.eq.s32.totalorder %v530_v20, 2  ;;  %v52_v51 = vld [vmem:[#allocation2 + $0xb] sm:$0x1] }
  0xd2   :  { %v4952_v43 = vsub.s32 %v600_v46, %v603_v44  ;;  %v4070_v2 = vpop.eup %4069  ;;  %v2890_v42 = vrot.slane %v2178_v6, %v4312_v31  ;;  %vm1367_vm13 = vcmp.lt.s32.totalorder %v1366_v9, 2  ;;  %vm1371_vm15 = vcmp.eq.s32.totalorder %v1366_v9, 2 }
  0xd3   :  { %v626_v48 = vsub.s32 4, %v602_v30  ;;  %v536_v58 = vxor.u32 2147483648, %v4070_v2  ;;  %vm1368_vm0 = vcmp.eq.s32.totalorder %v1366_v9, 0  ;;  %v658_v36 = vsub.s32 32, %v4939_v39 }
  0xd4   :  { %v606_v22 = vsub.s32 0, %v4952_v43  ;;  %v4072_v49 = vpop.eup %4071  ;;  %v2969_v13 = vsel %vm2574_vm6, %v2961_v29, %v2890_v42  ;;  %v596_v46 = vadd.s32 %v4878_v21, %v4874_v54  ;;  %v651_v40 = vor.u32 8388608, %v650_v37 }
  0xd5   :  { %v4960_v23 = vmul.f32 0.0, %v73_v17  ;;  %v2977_v56 = vsub.f32 0.0, %v2969_v13  ;;  %v533_v52 = vxor.u32 2147483648, %v4072_v49  ;;  %v537_v28 = vsel %vm535_vm12, %v536_v58, %v4072_v49  ;;  %v4074_v14 = vpop.eup %4073 }
  0xd6   :  { %v1373_v25 = vsel %vm1371_vm15, %v536_v58, %v4072_v49  ;;  %v3724_v55 = vmin.u32 %v606_v22, %v4952_v43  ;;  %v627_v44 = vsel %vm542_vm1, %v626_v48, %v602_v30  ;;  %v660_v6 = vshll.u32 %v6085_v26, %v4939_v39  ;;  %v43_v22 = vld [vmem:[#allocation2 + $0x3] sm:$0x1] }
  0xd7   :  { %v6130_v29 = vmov 2475754826   ;;  %2995 = vrot.lane.b32.xlu1 %v2977_v56, %s4187_s0  ;;  %v534_v21 = vsel %vm532_vm10, %v4070_v2, %v533_v52  ;;  %v1370_v37 = vsel %vm1368_vm0, %v4070_v2, %v533_v52  ;;  %v6131_v42 = vmov 2131351028  }
  0xd8   :  { %v663_v54 = vshll.u32 %v6130_v29, %v4939_v39  ;;  %v661_v17 = vshrl.u32 %v6130_v29, %v658_v36  ;;  %v664_v58 = vshrl.u32 %v6131_v42, %v658_v36  ;;  %v538_v49 = vsel %vm531_vm8, %v534_v21, %v537_v28 }
  0xd9   :  { %v1374_v30 = vsel %vm1367_vm13, %v1370_v37, %v1373_v25  ;;  %v608_v48 = vclz %v3724_v55  ;;  %v4977_v13 = vshll.u32 %v651_v40, 8  ;;  %v539_v56 = vsel %vm529_vm7, nan, %v538_v49 }
  0xda   :  { %v1375_v41 = vsel %vm529_vm7, nan, %v1374_v30  ;;  %v4985_v2 = vsel %vm4943_vm9, 0, %v627_v44  ;;  %v4987_v52 = vshrl.u32 %v655_v60, 5  ;;  %v955_v20 = vmul.f32 %v4074_v14, %v539_v56 }
  0xdb   :  { %v1795_v28 = vmul.f32 %v4074_v14, %v1375_v41  ;;  %v3725_v9 = vadd.s32 4294967294, %v608_v48  ;;  %v666_v40 = vshll.u32 %v6131_v42, %v4939_v39  ;;  %v659_v25 = vshrl.u32 %v6085_v26, %v658_v36  ;;  %v4999_v41 = vld [vmem:[#allocation2 + $0x2b] sm:$0x1] }
  0xdc   :  { %v662_v55 = vor.u32 %v661_v17, %v660_v6  ;;  %v4992_v21 = vor.u32 %v664_v58, %v663_v54  ;;  %v6132_v37 = vmov 2102212464   ;;  %v4995_v49 = vpop.eup %4075  ;;  %v1803_v30 = vmul.f32 %v955_v20, %v43_v22 }
  0xdd   :  { %v667_v15 = vshrl.u32 %v6132_v37, %v658_v36  ;;  %v1811_v44 = vmul.f32 %v1795_v28, %v52_v51  ;;  %v1827_v34 = vmul.f32 %v1795_v28, %v43_v22  ;;  %v1835_v60 = vmul.f32 %v955_v20, %v52_v51 }
  0xde   :  { %vm3726_vm7 = vcmp.lt.s32.totalorder %v3725_v9, 0  ;;  %v669_v14 = vshll.u32 %v6132_v37, %v4939_v39  ;;  %v6133_v48 = vmov 920167782   ;;  %v6135_v26 = vmov 1326507024  }
  0xdf   :  { %v670_v6 = vshrl.u32 %v6133_v48, %v658_v36  ;;  %v672_v54 = vshll.u32 %v6133_v48, %v4939_v39  ;;  %v5006_v17 = vsub.f32 %v1803_v30, %v1811_v44  ;;  %v1843_v58 = vadd.f32 %v1835_v60, %v1827_v34 }
  0xe0   :  { %v611_v56 = vsel %vm3726_vm7, 0, %v3725_v9  ;;  %v673_v22 = vshrl.u32 %v6135_v26, %v658_v36  ;;  %v668_v7 = vor.u32 %v667_v15, %v666_v40  ;;  %vm675_vm8 = vcmp.lt.s32.totalorder %v4987_v52, 1 }
  0xe1   :  { %6134 = vst [vmem:[#allocation18_spill] sm:$0xff] %v5006_v17  ;;  %v612_v51 = vsub.s32 32, %v611_v56  ;;  %v613_v20 = vshll.u32 %v4952_v43, %v611_v56  ;;  %v616_v28 = vsub.s32 4294967266, %v611_v56  ;;  %v1851_v59 = vmul.f32 %v5006_v17, %v4997_v57 }
  0xe2   :  { %v1859_v8 = vmul.f32 %v1843_v58, %v4999_v41  ;;  %v1875_v32 = vmul.f32 %v5006_v17, %v4999_v41  ;;  %v1883_v39 = vmul.f32 %v1843_v58, %v4997_v57  ;;  %v671_v9 = vor.u32 %v670_v6, %v669_v14 }
  0xe3   :  { %v614_v30 = vshrl.u32 %v596_v46, %v612_v51  ;;  %v617_v34 = vadd.s32 127, %v616_v28  ;;  %v674_v44 = vor.u32 %v673_v22, %v672_v54  ;;  %vm676_vm10 = vcmp.lt.s32.totalorder %v4987_v52, 2 }
  0xe4   :  { %v5017_v36 = vsub.f32 %v1851_v59, %v1859_v8  ;;  %v1891_v43 = vadd.f32 %v1883_v39, %v1875_v32  ;;  %vm677_vm12 = vcmp.lt.s32.totalorder %v4987_v52, 3  ;;  %vm678_vm13 = vcmp.lt.s32.totalorder %v4987_v52, 4 }
  0xe5   :  { %v615_v40 = vor.u32 %v614_v30, %v613_v20  ;;  %v618_v15 = vshll.u32 %v617_v34, 23  ;;  %v680_v54 = vsel %vm678_vm13, %v668_v7, 2102212464  ;;  %v683_v51 = vsel %vm675_vm8, %v662_v55, %v4992_v21 }
  0xe6   :  { %6136 = vst [vmem:[#allocation19_spill] sm:$0xff] %v5017_v36  ;;  %v1899_v60 = vmul.f32 %v5017_v36, %v4997_v57  ;;  %v1907_v46 = vmul.f32 %v1891_v43, %v4999_v41  ;;  %v1923_v14 = vmul.f32 %v5017_v36, %v4999_v41  ;;  %v1931_v8 = vmul.f32 %v1891_v43, %v4997_v57 }
  0xe7   :  { %v2606_v32 = vrot.slane %v1891_v43, %v4312_v31  ;;  %v619_v59 = vor.u32 4788187, %v618_v15  ;;  %v622_v6 = vcvt.s32.f32 %v615_v40  ;;  %v684_v20 = vsel %vm678_vm13, %v671_v9, 920167782 }
  0xe8   :  { %v5031_v56 = vsub.f32 %v1899_v60, %v1907_v46  ;;  %v1939_v22 = vadd.f32 %v1931_v8, %v1923_v14  ;;  %v685_v30 = vsel %vm677_vm12, %v668_v7, %v684_v20  ;;  %v687_v34 = vsel %vm675_vm8, %v4992_v21, %v668_v7 }
  0xe9   :  { %v2922_v28 = vsel %vm2520_vm11, %v1843_v58, %v2606_v32  ;;  %v620_v39 = vand.u32 2147483647, %v619_v59  ;;  %v679_v14 = vsel %vm675_vm8, %v659_v25, %v662_v55  ;;  %v688_v8 = vsel %vm678_vm13, %v674_v44, 1326507024 }
  0xea   :  { %6137 = vst [vmem:[#allocation20_spill] sm:$0xff] %v5031_v56  ;;  %v1947_v43 = vmul.f32 %v5031_v56, %v4997_v57  ;;  %v1955_v40 = vmul.f32 %v1939_v22, %v4999_v41  ;;  %v1971_v15 = vmul.f32 %v5031_v56, %v4999_v41  ;;  %v1979_v60 = vmul.f32 %v1939_v22, %v4997_v57 }
  0xeb   :  { %v2654_v58 = vrot.slane %v1939_v22, %v4312_v31  ;;  %v623_v46 = vmul.f32 %v622_v6, %v620_v39  ;;  %v681_v59 = vsel %vm677_vm12, %v4992_v21, %v680_v54  ;;  %v689_v20 = vsel %vm677_vm12, %v671_v9, %v688_v8 }
  0xec   :  { %v5055_v7 = vsub.f32 %v1947_v43, %v1955_v40  ;;  %v1987_v32 = vadd.f32 %v1979_v60, %v1971_v15  ;;  %v686_v6 = vsel %vm676_vm10, %v683_v51, %v685_v30  ;;  %v690_v25 = vsel %vm676_vm10, %v687_v34, %v689_v20 }
  0xed   :  { %v2930_v17 = vsel %vm2529_vm14, %v2922_v28, %v2654_v58  ;;  %v624_v22 = vxor.u32 2147483648, %v623_v46  ;;  %v5077_v51 = vmul.u32.u64.low %v4977_v13, %v690_v25  ;;  %v5078_v39 = vmul.u32.u64.high %v4977_v13, %v690_v25, %v5077_v51 }
  0xee   :  { %6138 = vst [vmem:[#allocation21_spill] sm:$0xff] %v5055_v7  ;;  %v1995_v55 = vmul.f32 %v5055_v7, %v4997_v57  ;;  %v2003_v44 = vmul.f32 %v1987_v32, %v4999_v41  ;;  %v2019_v21 = vmul.f32 %v5055_v7, %v4999_v41  ;;  %v2027_v54 = vmul.f32 %v1987_v32, %v4997_v57 }
  0xef   :  { %v2702_v9 = vrot.slane %v1987_v32, %v4312_v31  ;;  %v625_v28 = vsel %vm542_vm1, %v624_v22, %v623_v46  ;;  %v682_v40 = vsel %vm676_vm10, %v679_v14, %v681_v59  ;;  %v749_v20 = vand.u32 2139095040, %v4960_v23 }
  0xf0   :  { %v5080_v30 = vsub.f32 %v1995_v55, %v2003_v44  ;;  %v2035_v34 = vadd.f32 %v2027_v54, %v2019_v21  ;;  %v628_v43 = vsel %vm4943_vm9, %v4423_v38, %v625_v28  ;;  %v122_v25 = vmul.f32 1.442695, %v4947_v24 }
  0xf1   :  { %v2938_v15 = vsel %vm2538_vm2, %v2930_v17, %v2702_v9  ;;  %4077 = vcosq.f32 %v628_v43  ;;  %v5089_v60 = vmul.u32.u64.low %v4977_v13, %v686_v6  ;;  %v5090_v58 = vmul.u32.u64.high %v4977_v13, %v686_v6, %v5089_v60 }
  0xf2   :  { %6139 = vst [vmem:[#allocation22_spill] sm:$0xff] %v5080_v30  ;;  %v2043_v46 = vmul.f32 %v5080_v30, %v4997_v57  ;;  %v2051_v8 = vmul.f32 %v2035_v34, %v4999_v41  ;;  %v2067_v18 = vmul.f32 %v5080_v30, %v4999_v41  ;;  %v2075_v32 = vmul.f32 %v2035_v34, %v4997_v57 }
  0xf3   :  { %v2750_v52 = vrot.slane %v2035_v34, %v4312_v31  ;;  %4079 = vsinq.f32 %v628_v43  ;;  %v698_v17 = vmul.u32 %v4977_v13, %v682_v40  ;;  %vm700_vm1 = vc.u32 %v5078_v39, %v5089_v60 }
  0xf4   :  { %v5101_v14 = vsub.f32 %v2043_v46, %v2051_v8  ;;  %v2083_v59 = vadd.f32 %v2075_v32, %v2067_v18  ;;  %v1469_v6 = vadd.s32 3, %v4985_v2  ;;  %v701_v55 = vadd.s32 1, %v5090_v58  ;;  %v64_v46 = vld [vmem:[#allocation2 + $0x16] sm:$0x1] }
  0xf5   :  { %v2946_v22 = vsel %vm2547_vm3, %v2938_v15, %v2750_v52  ;;  %v6092_v51 = vand.u32 2147483647, %v4960_v23  ;;  %v750_v34 = vshrl.u32 %v749_v20, 23  ;;  %v633_v40 = vand.u32 3, %v4985_v2 }
  0xf6   :  { %6140 = vst [vmem:[#allocation23_spill] sm:$0xff] %v5101_v14  ;;  %v2091_v44 = vmul.f32 %v5101_v14, %v4997_v57  ;;  %v2099_v13 = vmul.f32 %v2083_v59, %v4999_v41  ;;  %v2115_v21 = vmul.f32 %v5101_v14, %v4999_v41  ;;  %v2123_v54 = vmul.f32 %v2083_v59, %v4997_v57 }
  0xf7   :  { %v2798_v9 = vrot.slane %v2083_v59, %v4312_v31  ;;  %v702_v28 = vsel %vm700_vm1, %v701_v55, %v5090_v58  ;;  %v1470_v18 = vand.u32 3, %v1469_v6  ;;  %v3731_v32 = vadd.s32 4294967169, %v750_v34 }
  0xf8   :  { %v5119_v24 = vsub.f32 %v2091_v44, %v2099_v13  ;;  %v5121_v43 = vadd.f32 %v2123_v54, %v2115_v21  ;;  %v703_v15 = vadd.s32 %v702_v28, %v698_v17  ;;  %vm632_vm9 = vweird.f32 %v4423_v38 }
  0xf9   :  { %v2954_v8 = vsel %vm2556_vm4, %v2946_v22, %v2798_v9  ;;  %4081 = vpow2.f32 %v122_v25  ;;  %v102_v2 = vmul.f32 0.0, %v64_v46  ;;  %v753_v17 = vand.u32 8388607, %v6092_v51  ;;  %v53_v51 = vld [vmem:[#allocation2 + $0xc] sm:$0x1] }
  0xfa   :  { %6141 = vst [vmem:[#allocation24_spill] sm:$0xff] %v5119_v24  ;;  %6142 = vst [vmem:[#allocation25_spill] sm:$0xff] %v5121_v43  ;;  %v2163_v52 = vmul.f32 %v5119_v24, %v4999_v41  ;;  %v2171_v58 = vmul.f32 %v5121_v43, %v4997_v57  ;;  %v2846_v59 = vrot.slane %v5121_v43, %v4312_v31  ;;  %v704_v20 = vadd.s32 536870912, %v703_v15  ;;  %v74_v57 = vld [vmem:[#allocation2 + $0x1f] sm:$0x1] }
  0xfb   :  { %v756_v22 = vadd.s32 1, %v3731_v32  ;;  %vm634_vm15 = vcmp.lt.s32.totalorder %v633_v40, 2  ;;  %vm635_vm0 = vcmp.eq.s32.totalorder %v633_v40, 0  ;;  %vm638_vm7 = vcmp.eq.s32.totalorder %v633_v40, 2 }
  0xfc   :  { %v2179_v6 = vadd.f32 %v2171_v58, %v2163_v52  ;;  %v705_v55 = vshrl.u32 %v704_v20, 30  ;;  %v2962_v41 = vsel %vm2565_vm5, %v2954_v8, %v2846_v59  ;;  %vm1471_vm8 = vcmp.lt.s32.totalorder %v1470_v18, 2 }
  0xfd   :  { %vm757_vm10 = vcmp.gt.s32.totalorder %v756_v22, 0  ;;  %vm1475_vm12 = vcmp.eq.s32.totalorder %v1470_v18, 2  ;;  %vm1472_vm13 = vcmp.eq.s32.totalorder %v1470_v18, 0  ;;  %v754_v9 = vor.u32 8388608, %v753_v17 }
  0xfe   :  { %v4078_v44 = vpop.eup %4077  ;;  %v2894_v13 = vrot.slane %v2179_v6, %v4312_v31  ;;  %v706_v25 = vshll.u32 %v705_v55, 30  ;;  %v758_v21 = vsel %vm757_vm10, %v756_v22, 0  ;;  %v6143_v8 = vand.u32 2147483647, %v4764_v50 }
  0xff   :  { %v639_v54 = vxor.u32 2147483648, %v4078_v44  ;;  %v5136_v28 = vand.u32 31, %v758_v21  ;;  %v729_v58 = vsub.s32 4, %v705_v55  ;;  %v5147_v59 = vmul.f32 0.0, %v74_v57 }
 0x100   :  { %v4080_v34 = vpop.eup %4079  ;;  %v2970_v46 = vsel %vm2574_vm6, %v2962_v41, %v2894_v13  ;;  %vm5141_vm1 = vcmp.le.f32.partialorder %v6143_v8, 0.7853982  ;;  %v5145_v52 = vsub.s32 %v703_v15, %v706_v25  ;;  %vm645_vm10 = vcmp.lt.s32.totalorder %v4764_v50, 0 }
 0x101   :  { %v2978_v20 = vsub.f32 0.0, %v2970_v46  ;;  %v636_v22 = vxor.u32 2147483648, %v4080_v34  ;;  %v640_v17 = vsel %vm638_vm7, %v639_v54, %v4080_v34  ;;  %v1477_v6 = vsel %vm1475_vm12, %v639_v54, %v4080_v34  ;;  %v44_v54 = vld [vmem:[#allocation2 + $0x4] sm:$0x1] }
 0x102   :  { %v5154_v41 = vadd.s32 %v5089_v60, %v5078_v39  ;;  %v709_v13 = vsub.s32 0, %v5145_v52  ;;  %v5157_v8 = vmul.f32 1.442695, %v102_v2  ;;  %v761_v25 = vsub.s32 32, %v5136_v28 }
 0x103   :  { %2997 = vrot.lane.b32.xlu1 %v2978_v20, %s4187_s0  ;;  %v637_v15 = vsel %vm635_vm0, %v4078_v44, %v636_v22  ;;  %v1474_v57 = vsel %vm1472_vm13, %v4078_v44, %v636_v22  ;;  %v5163_v46 = vshll.u32 %v754_v9, 8  ;;  %v730_v9 = vsel %vm645_vm10, %v729_v58, %v705_v55  ;;  %v5188_v58 = vld [vmem:[#allocation2 + $0x24] sm:$0x1] }
 0x104   :  { %v641_v34 = vsel %vm634_vm15, %v637_v15, %v640_v17  ;;  %v1478_v39 = vsel %vm1471_vm8, %v1474_v57, %v1477_v6  ;;  %v3728_v60 = vmin.u32 %v709_v13, %v5145_v52  ;;  %v852_v22 = vand.u32 2139095040, %v5147_v59 }
 0x105   :  { %v642_v20 = vsel %vm632_vm9, nan, %v641_v34  ;;  %v1479_v44 = vsel %vm632_vm9, nan, %v1478_v39  ;;  %v6146_v6 = vmov 683565275   ;;  %v5180_v15 = vshrl.u32 %v758_v21, 5 }
 0x106   :  { %v956_v40 = vmul.f32 %v4995_v49, %v642_v20  ;;  %v1796_v18 = vmul.f32 %v4995_v49, %v1479_v44  ;;  %v711_v17 = vclz %v3728_v60  ;;  %v763_v13 = vshll.u32 %v6146_v6, %v5136_v28  ;;  %v5186_v55 = vpop.eup %4081  ;;  %v5190_v44 = vld [vmem:[#allocation2 + $0x2c] sm:$0x1] }
 0x107   :  { %v764_v57 = vshrl.u32 %v6130_v29, %v761_v25  ;;  %v766_v38 = vshll.u32 %v6130_v29, %v5136_v28  ;;  %v767_v34 = vshrl.u32 %v6131_v42, %v761_v25  ;;  %v5194_v21 = vsel %vm5141_vm1, 0, %v730_v9 }
 0x108   :  { %v1804_v39 = vmul.f32 %v956_v40, %v44_v54  ;;  %v1812_v20 = vmul.f32 %v1796_v18, %v53_v51  ;;  %v1828_v49 = vmul.f32 %v1796_v18, %v44_v54  ;;  %v1836_v60 = vmul.f32 %v956_v40, %v53_v51 }
 0x109   :  { %v3729_v2 = vadd.s32 4294967294, %v711_v17  ;;  %v762_v14 = vshrl.u32 %v6146_v6, %v761_v25  ;;  %v5197_v30 = vshrl.u32 %v852_v22, 23  ;;  %v765_v36 = vor.u32 %v764_v57, %v763_v13 }
 0x10a   :  { %v5199_v7 = vsub.f32 %v1804_v39, %v1812_v20  ;;  %v1844_v56 = vadd.f32 %v1836_v60, %v1828_v49  ;;  %v5201_v43 = vor.u32 %v767_v34, %v766_v38  ;;  %v769_v51 = vshll.u32 %v6131_v42, %v5136_v28 }
 0x10b   :  { %vm3730_vm9 = vcmp.lt.s32.totalorder %v3729_v2, 0  ;;  %v770_v54 = vshrl.u32 %v6132_v37, %v761_v25  ;;  %v772_v9 = vshll.u32 %v6132_v37, %v5136_v28  ;;  %v773_v38 = vshrl.u32 %v6133_v48, %v761_v25 }
 0x10c   :  { %6147 = vst [vmem:[#allocation26_spill] sm:$0xff] %v5199_v7  ;;  %v1852_v40 = vmul.f32 %v5199_v7, %v5188_v58  ;;  %v1860_v22 = vmul.f32 %v1844_v56, %v5190_v44  ;;  %v1876_v18 = vmul.f32 %v5199_v7, %v5190_v44  ;;  %v1884_v17 = vmul.f32 %v1844_v56, %v5188_v58 }
 0x10d   :  { %v714_v13 = vsel %vm3730_vm9, 0, %v3729_v2  ;;  %v771_v57 = vor.u32 %v770_v54, %v769_v51  ;;  %v775_v34 = vshll.u32 %v6133_v48, %v5136_v28  ;;  %v774_v1 = vor.u32 %v773_v38, %v772_v9 }
 0x10e   :  { %v5217_v39 = vsub.f32 %v1852_v40, %v1860_v22  ;;  %v1892_v20 = vadd.f32 %v1884_v17, %v1876_v18  ;;  %v715_v49 = vsub.s32 32, %v714_v13  ;;  %v716_v60 = vshll.u32 %v5145_v52, %v714_v13 }
 0x10f   :  { %v719_v24 = vsub.s32 4294967266, %v714_v13  ;;  %v776_v53 = vshrl.u32 %v6135_v26, %v761_v25  ;;  %vm778_vm15 = vcmp.lt.s32.totalorder %v5180_v15, 1  ;;  %vm779_vm0 = vcmp.lt.s32.totalorder %v5180_v15, 2 }
 0x110   :  { %6148 = vst [vmem:[#allocation27_spill] sm:$0xff] %v5217_v39  ;;  %v1900_v2 = vmul.f32 %v5217_v39, %v5188_v58  ;;  %v1908_v51 = vmul.f32 %v1892_v20, %v5190_v44  ;;  %v1924_v28 = vmul.f32 %v5217_v39, %v5190_v44  ;;  %v1932_v54 = vmul.f32 %v1892_v20, %v5188_v58 }
 0x111   :  { %v2610_v40 = vrot.slane %v1892_v20, %v4312_v31  ;;  %v717_v52 = vshrl.u32 %v5154_v41, %v715_v49  ;;  %v720_v22 = vadd.s32 127, %v719_v24  ;;  %v777_v9 = vor.u32 %v776_v53, %v775_v34 }
 0x112   :  { %v5230_v18 = vsub.f32 %v1900_v2, %v1908_v51  ;;  %v1940_v25 = vadd.f32 %v1932_v54, %v1924_v28  ;;  %vm780_vm7 = vcmp.lt.s32.totalorder %v5180_v15, 3  ;;  %vm781_vm8 = vcmp.lt.s32.totalorder %v5180_v15, 4 }
 0x113   :  { %v2923_v17 = vsel %vm2520_vm11, %v1844_v56, %v2610_v40  ;;  %v718_v13 = vor.u32 %v717_v52, %v716_v60  ;;  %v721_v38 = vshll.u32 %v720_v22, 23  ;;  %v782_v56 = vsel %vm778_vm15, %v762_v14, %v765_v36 }
 0x114   :  { %6149 = vst [vmem:[#allocation28_spill] sm:$0xff] %v5230_v18  ;;  %v1948_v20 = vmul.f32 %v5230_v18, %v5188_v58  ;;  %v1956_v41 = vmul.f32 %v1940_v25, %v5190_v44  ;;  %v1972_v53 = vmul.f32 %v5230_v18, %v5190_v44  ;;  %v1980_v24 = vmul.f32 %v1940_v25, %v5188_v58 }
 0x115   :  { %v2658_v34 = vrot.slane %v1940_v25, %v4312_v31  ;;  %v722_v49 = vor.u32 4788187, %v721_v38  ;;  %v725_v2 = vcvt.s32.f32 %v718_v13  ;;  %v783_v28 = vsel %vm781_vm8, %v771_v57, 2102212464 }
 0x116   :  { %v5245_v60 = vsub.f32 %v1948_v20, %v1956_v41  ;;  %v1988_v51 = vadd.f32 %v1980_v24, %v1972_v53  ;;  %v786_v54 = vsel %vm778_vm15, %v765_v36, %v5201_v43  ;;  %v784_v22 = vsel %vm780_vm7, %v5201_v43, %v783_v28 }
 0x117   :  { %v2931_v40 = vsel %vm2529_vm14, %v2923_v17, %v2658_v34  ;;  %v723_v52 = vand.u32 2147483647, %v722_v49  ;;  %v787_v14 = vsel %vm781_vm8, %v774_v1, 920167782  ;;  %v1573_v41 = vadd.s32 3, %v5194_v21 }
 0x118   :  { %6150 = vst [vmem:[#allocation29_spill] sm:$0xff] %v5245_v60  ;;  %v1996_v25 = vmul.f32 %v5245_v60, %v5188_v58  ;;  %v2004_v13 = vmul.f32 %v1988_v51, %v5190_v44  ;;  %v2020_v38 = vmul.f32 %v5245_v60, %v5190_v44  ;;  %v2028_v36 = vmul.f32 %v1988_v51, %v5188_v58 }
 0x119   :  { %v2706_v17 = vrot.slane %v1988_v51, %v4312_v31  ;;  %v726_v20 = vmul.f32 %v725_v2, %v723_v52  ;;  %v788_v53 = vsel %vm780_vm7, %v771_v57, %v787_v14  ;;  %v785_v49 = vsel %vm779_vm0, %v782_v56, %v784_v22 }
 0x11a   :  { %v5268_v24 = vsub.f32 %v1996_v25, %v2004_v13  ;;  %v2036_v34 = vadd.f32 %v2028_v36, %v2020_v38  ;;  %v789_v28 = vsel %vm779_vm0, %v786_v54, %v788_v53  ;;  %v790_v2 = vsel %vm778_vm15, %v5201_v43, %v771_v57 }
 0x11b   :  { %v2939_v60 = vsel %vm2538_vm2, %v2931_v40, %v2706_v17  ;;  %v727_v7 = vxor.u32 2147483648, %v726_v20  ;;  %v791_v51 = vsel %vm781_vm8, %v777_v9, 1326507024  ;;  %v3735_v57 = vadd.s32 4294967169, %v5197_v30 }
 0x11c   :  { %6151 = vst [vmem:[#allocation30_spill] sm:$0xff] %v5268_v24  ;;  %v2044_v52 = vmul.f32 %v5268_v24, %v5188_v58  ;;  %v2052_v14 = vmul.f32 %v2036_v34, %v5190_v44  ;;  %v2068_v56 = vmul.f32 %v5268_v24, %v5190_v44  ;;  %v2076_v54 = vmul.f32 %v2036_v34, %v5188_v58 }
 0x11d   :  { %v2754_v40 = vrot.slane %v2036_v34, %v4312_v31  ;;  %v728_v22 = vsel %vm645_vm10, %v727_v7, %v726_v20  ;;  %v792_v43 = vsel %vm780_vm7, %v774_v1, %v791_v51  ;;  %v65_v1 = vld [vmem:[#allocation2 + $0x17] sm:$0x1] }
 0x11e   :  { %v5292_v9 = vsub.f32 %v2044_v52, %v2052_v14  ;;  %v2084_v25 = vadd.f32 %v2076_v54, %v2068_v56  ;;  %v731_v13 = vsel %vm5141_vm1, %v4764_v50, %v728_v22  ;;  %v793_v38 = vsel %vm779_vm0, %v790_v2, %v792_v43 }
 0x11f   :  { %v2947_v36 = vsel %vm2547_vm3, %v2939_v60, %v2754_v40  ;;  %4083 = vcosq.f32 %v731_v13  ;;  %v5301_v7 = vmul.u32.u64.low %v5163_v46, %v793_v38  ;;  %v5302_v17 = vmul.u32.u64.high %v5163_v46, %v793_v38, %v5301_v7 }
 0x120   :  { %6152 = vst [vmem:[#allocation31_spill] sm:$0xff] %v5292_v9  ;;  %v2092_v30 = vmul.f32 %v5292_v9, %v5188_v58  ;;  %v2100_v20 = vmul.f32 %v2084_v25, %v5190_v44  ;;  %v2116_v32 = vmul.f32 %v5292_v9, %v5190_v44  ;;  %v2124_v53 = vmul.f32 %v2084_v25, %v5188_v58 }
 0x121   :  { %v2802_v15 = vrot.slane %v2084_v25, %v4312_v31  ;;  %4085 = vsinq.f32 %v731_v13  ;;  %v5312_v60 = vmul.u32.u64.low %v5163_v46, %v789_v28  ;;  %v5313_v34 = vmul.u32.u64.high %v5163_v46, %v789_v28, %v5312_v60 }
 0x122   :  { %v5315_v2 = vsub.f32 %v2092_v30, %v2100_v20  ;;  %v5317_v51 = vadd.f32 %v2124_v53, %v2116_v32  ;;  %v103_v52 = vmul.f32 0.0, %v65_v1  ;;  %v859_v14 = vadd.s32 1, %v3735_v57 }
 0x123   :  { %v2955_v56 = vsel %vm2556_vm4, %v2947_v36, %v2802_v15  ;;  %v801_v54 = vmul.u32 %v5163_v46, %v785_v49  ;;  %vm803_vm12 = vc.u32 %v5302_v17, %v5312_v60  ;;  %v6153_v40 = vand.u32 2147483647, %v5147_v59 }
 0x124   :  { %v2164_v43 = vmul.f32 %v5315_v2, %v5190_v44  ;;  %v2172_v28 = vmul.f32 %v5317_v51, %v5188_v58  ;;  %v2850_v25 = vrot.slane %v5317_v51, %v4312_v31  ;;  %vm860_vm13 = vcmp.gt.s32.totalorder %v859_v14, 0 }
 0x125   :  { %v856_v22 = vand.u32 8388607, %v6153_v40  ;;  %v736_v57 = vand.u32 3, %v5194_v21  ;;  %v1574_v13 = vand.u32 3, %v1573_v41  ;;  %v804_v46 = vadd.s32 1, %v5313_v34 }
 0x126   :  { %v861_v49 = vsel %vm860_vm13, %v859_v14, 0  ;;  %v2180_v38 = vadd.f32 %v2172_v28, %v2164_v43  ;;  %v2963_v7 = vsel %vm2565_vm5, %v2955_v56, %v2850_v25  ;;  %4087 = vpow2.f32 %v5157_v8 }
 0x127   :  { %v863_v36 = vand.u32 31, %v861_v49  ;;  %v805_v44 = vsel %vm803_vm12, %v804_v46, %v5313_v34  ;;  %v857_v1 = vor.u32 8388608, %v856_v22  ;;  %vm735_vm1 = vweird.f32 %v4764_v50 }
 0x128   :  { %v2898_v58 = vrot.slane %v2180_v38, %v4312_v31  ;;  %v806_v30 = vadd.s32 %v805_v44, %v801_v54  ;;  %v5337_v20 = vmul.f32 1.442695, %v103_v52  ;;  %vm737_vm10 = vcmp.lt.s32.totalorder %v736_v57, 2 }
 0x129   :  { %v864_v21 = vsub.s32 32, %v863_v36  ;;  %vm738_vm9 = vcmp.eq.s32.totalorder %v736_v57, 0  ;;  %vm741_vm15 = vcmp.eq.s32.totalorder %v736_v57, 2  ;;  %vm1575_vm0 = vcmp.lt.s32.totalorder %v1574_v13, 2 }
 0x12a   :  { %v2971_v41 = vsel %vm2574_vm6, %v2963_v7, %v2898_v58  ;;  %vm1576_vm7 = vcmp.eq.s32.totalorder %v1574_v13, 0  ;;  %vm1579_vm8 = vcmp.eq.s32.totalorder %v1574_v13, 2  ;;  %vm748_vm13 = vcmp.lt.s32.totalorder %v4960_v23, 0 }
 0x12b   :  { %v807_v8 = vadd.s32 536870912, %v806_v30  ;;  %v2979_v32 = vsub.f32 0.0, %v2971_v41  ;;  %v5342_v53 = vadd.s32 %v5312_v60, %v5302_v17  ;;  %v5344_v15 = vshrl.u32 %v861_v49, 5 }
 0x12c   :  { %v5346_v34 = vshll.u32 %v857_v1, 8  ;;  %v4084_v52 = vpop.eup %4083  ;;  %v866_v56 = vshll.u32 %v6146_v6, %v863_v36  ;;  %v867_v54 = vshrl.u32 %v6130_v29, %v864_v21  ;;  %v869_v40 = vshll.u32 %v6130_v29, %v863_v36 }
 0x12d   :  { %v808_v14 = vshrl.u32 %v807_v8, 30  ;;  %2999 = vrot.lane.b32.xlu0 %v2979_v32, %s4187_s0  ;;  %v742_v22 = vxor.u32 2147483648, %v4084_v52  ;;  %v870_v43 = vshrl.u32 %v6131_v42, %v864_v21  ;;  %v872_v17 = vshll.u32 %v6131_v42, %v863_v36 }
 0x12e   :  { %v873_v60 = vshrl.u32 %v6132_v37, %v864_v21  ;;  %v4086_v28 = vpop.eup %4085  ;;  %v6154_v25 = vand.u32 2147483647, %v4960_v23  ;;  %v875_v38 = vshll.u32 %v6132_v37, %v863_v36  ;;  %v876_v29 = vshrl.u32 %v6133_v48, %v864_v21 }
 0x12f   :  { %v809_v49 = vshll.u32 %v808_v14, 30  ;;  %v878_v7 = vshll.u32 %v6133_v48, %v863_v36  ;;  %v739_v44 = vxor.u32 2147483648, %v4086_v28  ;;  %v743_v1 = vsel %vm741_vm15, %v742_v22, %v4086_v28  ;;  %v45_v48 = vld [vmem:[#allocation2 + $0x5] sm:$0x1] }
 0x130   :  { %vm5357_vm12 = vcmp.le.f32.partialorder %v6154_v25, 0.7853982  ;;  %v1581_v42 = vsel %vm1579_vm8, %v742_v22, %v4086_v28  ;;  %v832_v58 = vsub.s32 4, %v808_v14  ;;  %v865_v8 = vshrl.u32 %v6146_v6, %v864_v21  ;;  %v54_v28 = vld [vmem:[#allocation2 + $0xd] sm:$0x1] }
 0x131   :  { %v5366_v41 = vsub.s32 %v806_v30, %v809_v49  ;;  %v868_v32 = vor.u32 %v867_v54, %v866_v56  ;;  %v879_v25 = vshrl.u32 %v6135_v26, %v864_v21  ;;  %v740_v9 = vsel %vm738_vm9, %v4084_v52, %v739_v44 }
 0x132   :  { %v1578_v37 = vsel %vm1576_vm7, %v4084_v52, %v739_v44  ;;  %v871_v24 = vor.u32 %v870_v43, %v869_v40  ;;  %v874_v18 = vor.u32 %v873_v60, %v872_v17  ;;  %v744_v36 = vsel %vm737_vm10, %v740_v9, %v743_v1  ;;  %v5392_v43 = vld [vmem:[#allocation2 + $0x25] sm:$0x1]  ;;  %v5394_v17 = vld [vmem:[#allocation2 + $0x2d] sm:$0x1] }
 0x133   :  { %v1582_v39 = vsel %vm1575_vm0, %v1578_v37, %v1581_v42  ;;  %v812_v22 = vsub.s32 0, %v5366_v41  ;;  %v877_v30 = vor.u32 %v876_v29, %v875_v38  ;;  %v745_v6 = vsel %vm735_vm1, nan, %v744_v36  ;;  %v5382_v52 = vpop.eup %4087 }
 0x134   :  { %v1583_v26 = vsel %vm735_vm1, nan, %v1582_v39  ;;  %v833_v21 = vsel %vm748_vm13, %v832_v58, %v808_v14  ;;  %vm884_vm9 = vcmp.lt.s32.totalorder %v5344_v15, 4  ;;  %v957_v9 = vmul.f32 %v5186_v55, %v745_v6 }
 0x135   :  { %v1797_v57 = vmul.f32 %v5186_v55, %v1583_v26  ;;  %v3732_v13 = vmin.u32 %v812_v22, %v5366_v41  ;;  %v886_v56 = vsel %vm884_vm9, %v874_v18, 2102212464  ;;  %v880_v54 = vor.u32 %v879_v25, %v878_v7 }
 0x136   :  { %vm881_vm10 = vcmp.lt.s32.totalorder %v5344_v15, 1  ;;  %vm882_vm1 = vcmp.lt.s32.totalorder %v5344_v15, 2  ;;  %vm883_vm15 = vcmp.lt.s32.totalorder %v5344_v15, 3  ;;  %v1805_v50 = vmul.f32 %v957_v9, %v45_v48  ;;  %v3030_v15 = vld [vmem:[#allocation5 + $0x30] sm:$0xff] }
 0x137   :  { %v1813_v39 = vmul.f32 %v1797_v57, %v54_v28  ;;  %v1829_v14 = vmul.f32 %v1797_v57, %v45_v48  ;;  %v1837_v40 = vmul.f32 %v957_v9, %v54_v28  ;;  %v814_v55 = vclz %v3732_v13  ;;  %v3031_v9 = vld [vmem:[#allocation5 + $0x38] sm:$0xff] }
 0x138   :  { %v5398_v60 = vsel %vm5357_vm12, 0, %v833_v21  ;;  %v885_v49 = vsel %vm881_vm10, %v865_v8, %v868_v32  ;;  %v887_v38 = vsel %vm883_vm15, %v871_v24, %v886_v56  ;;  %v889_v44 = vsel %vm881_vm10, %v868_v32, %v871_v24 }
 0x139   :  { %v5404_v29 = vsub.f32 %v1805_v50, %v1813_v39  ;;  %v1845_v7 = vadd.f32 %v1837_v40, %v1829_v14  ;;  %v890_v1 = vsel %vm884_vm9, %v877_v30, 920167782  ;;  %v3733_v42 = vadd.s32 4294967294, %v814_v55 }
 0x13a   :  { %v891_v58 = vsel %vm883_vm15, %v874_v18, %v890_v1  ;;  %v893_v25 = vsel %vm881_vm10, %v871_v24, %v874_v18  ;;  %v894_v8 = vsel %vm884_vm9, %v880_v54, 1326507024  ;;  %v5424_v22 = vsel %vm882_vm1, %v885_v49, %v887_v38  ;;  %v3039_v54 = vld [vmem:[#allocation5 + $0x78] sm:$0xff] }
 0x13b   :  { %v1853_v37 = vmul.f32 %v5404_v29, %v5392_v43  ;;  %v1861_v48 = vmul.f32 %v1845_v7, %v5394_v17  ;;  %v1877_v32 = vmul.f32 %v5404_v29, %v5394_v17  ;;  %v1885_v36 = vmul.f32 %v1845_v7, %v5392_v43 }
 0x13c   :  { %vm3734_vm0 = vcmp.lt.s32.totalorder %v3733_v42, 0  ;;  %v5428_v18 = vsel %vm882_vm1, %v889_v44, %v891_v58  ;;  %v895_v24 = vsel %vm883_vm15, %v877_v30, %v894_v8  ;;  %v4188_v40 = vmov 0.0   ;;  %v3038_v8 = vld [vmem:[#allocation5 + $0x70] sm:$0xff] }
 0x13d   :  { %v5432_v28 = vsub.f32 %v1853_v37, %v1861_v48  ;;  %v1893_v6 = vadd.f32 %v1885_v36, %v1877_v32  ;;  %v817_v26 = vsel %vm3734_vm0, 0, %v3733_v42  ;;  %v896_v21 = vsel %vm882_vm1, %v893_v25, %v895_v24  ;;  %3851 = vmatprep.subr.mxu0 %v4188_v40  ;;  %3870 = vmatprep.subr.mxu1 %v4188_v40  ;;  %v3029_v25 = vld [vmem:[#allocation5 + $0x28] sm:$0xff]  ;;  %v4099_v32 = vld [vmem:[#allocation2 + $0x28] sm:$0x1] }
 0x13e   :  { %v818_v57 = vsub.s32 32, %v817_v26  ;;  %v819_v13 = vshll.u32 %v5366_v41, %v817_v26  ;;  %v822_v56 = vsub.s32 4294967266, %v817_v26  ;;  %v904_v38 = vmul.u32 %v5346_v34, %v5424_v22  ;;  %3852 = vmatpush3.msra.mxu0 %v3031_v9  ;;  %3871 = vmatpush3.msra.mxu1 %v3039_v54  ;;  %v3037_v9 = vld [vmem:[#allocation5 + $0x68] sm:$0xff] }
 0x13f   :  { %v1901_v50 = vmul.f32 %v5432_v28, %v5392_v43  ;;  %v1909_v39 = vmul.f32 %v1893_v6, %v5394_v17  ;;  %v1925_v30 = vmul.f32 %v5432_v28, %v5394_v17  ;;  %v1933_v14 = vmul.f32 %v1893_v6, %v5392_v43  ;;  %3853 = vmatprep.subr.mxu0 %v4188_v40 }
 0x140   :  { %v2614_v55 = vrot.slane %v1893_v6, %v4312_v31  ;;  %v820_v41 = vshrl.u32 %v5342_v53, %v818_v57  ;;  %v823_v49 = vadd.s32 127, %v822_v56  ;;  %3854 = vmatpush3.msra.mxu0 %v3030_v15  ;;  %3872 = vmatprep.subr.mxu1 %v4188_v40  ;;  %v5459_v36 = vmul.f32 %v4099_v32, %v4667_v12 }
 0x141   :  { %v5449_v44 = vsub.f32 %v1901_v50, %v1909_v39  ;;  %v1941_v1 = vadd.f32 %v1933_v14, %v1925_v30  ;;  %v5452_v42 = vmul.u32.u64.low %v5346_v34, %v896_v21  ;;  %v5453_v58 = vmul.u32.u64.high %v5346_v34, %v896_v21, %v5452_v42  ;;  %3855 = vmatprep.subr.mxu0 %v4188_v40  ;;  %3873 = vmatpush3.msra.mxu1 %v3038_v8  ;;  %v3027_v14 = vld [vmem:[#allocation5 + $0x18] sm:$0xff]  ;;  %v3036_v8 = vld [vmem:[#allocation5 + $0x60] sm:$0xff] }
 0x142   :  { %v2924_v53 = vsel %vm2520_vm11, %v1845_v7, %v2614_v55  ;;  %v821_v37 = vor.u32 %v820_v41, %v819_v13  ;;  %v824_v48 = vshll.u32 %v823_v49, 23  ;;  %v3028_v7 = vld [vmem:[#allocation5 + $0x20] sm:$0xff]  ;;  %3856 = vmatpush3.msra.mxu0 %v3029_v25  ;;  %v2195_v12 = vrot.slane %v4551_v27, %v4312_v31  ;;  %3874 = vmatprep.subr.mxu1 %v4188_v40  ;;  %v3026_v25 = vld [vmem:[#allocation5 + $0x10] sm:$0xff] }
 0x143   :  { %v1949_v24 = vmul.f32 %v5449_v44, %v5392_v43  ;;  %v1957_v6 = vmul.f32 %v1941_v1, %v5394_v17  ;;  %v1973_v26 = vmul.f32 %v5449_v44, %v5394_v17  ;;  %v1981_v21 = vmul.f32 %v1941_v1, %v5392_v43  ;;  %3857 = vmatprep.subr.mxu0 %v4188_v40 }
 0x144   :  { %v2662_v57 = vrot.slane %v1941_v1, %v4312_v31  ;;  %v825_v13 = vor.u32 4788187, %v824_v48  ;;  %v828_v56 = vcvt.s32.f32 %v821_v37  ;;  %3858 = vmatpush3.msra.mxu0 %v3028_v7  ;;  %3875 = vmatpush3.msra.mxu1 %v3037_v9  ;;  %v2243_v27 = vrot.slane %v4573_v63, %v4312_v31  ;;  %v3035_v9 = vld [vmem:[#allocation5 + $0x58] sm:$0xff] }
 0x145   :  { %v5471_v54 = vsub.f32 %v1949_v24, %v1957_v6  ;;  %v1989_v50 = vadd.f32 %v1981_v21, %v1973_v26  ;;  %v5475_v39 = vmul.u32.u64.low %v5346_v34, %v5428_v18  ;;  %v5476_v30 = vmul.u32.u64.high %v5346_v34, %v5428_v18, %v5475_v39  ;;  %3859 = vmatprep.subr.mxu0 %v4188_v40  ;;  %3876 = vmatprep.subr.mxu1 %v4188_v40  ;;  %v3025_v6 = vld [vmem:[#allocation5 + $0x8] sm:$0xff] }
 0x146   :  { %v2932_v15 = vsel %vm2529_vm14, %v2924_v53, %v2662_v57  ;;  %v826_v55 = vand.u32 2147483647, %v825_v13  ;;  %v2291_v41 = vrot.slane %v4591_v11, %v4312_v31  ;;  %3860 = vmatpush3.msra.mxu0 %v3027_v14  ;;  %v2339_v37 = vrot.slane %v4617_v10, %v4312_v31  ;;  %3877 = vmatpush3.msra.mxu1 %v3036_v8 }
 0x147   :  { %v1997_v18 = vmul.f32 %v5471_v54, %v5392_v43  ;;  %v2005_v49 = vmul.f32 %v1989_v50, %v5394_v17  ;;  %v2021_v1 = vmul.f32 %v5471_v54, %v5394_v17  ;;  %v2029_v42 = vmul.f32 %v1989_v50, %v5392_v43  ;;  %3861 = vmatprep.subr.mxu0 %v4188_v40 }
 0x148   :  { %v2710_v53 = vrot.slane %v1989_v50, %v4312_v31  ;;  %v829_v63 = vmul.f32 %v828_v56, %v826_v55  ;;  %vm906_vm7 = vc.u32 %v5453_v58, %v5475_v39  ;;  %v907_v24 = vadd.s32 1, %v5476_v30  ;;  %3862 = vmatpush3.msra.mxu0 %v3026_v25  ;;  %3878 = vmatprep.subr.mxu1 %v4188_v40  ;;  %v3034_v25 = vld [vmem:[#allocation5 + $0x50] sm:$0xff] }
 0x149   :  { %v5498_v48 = vsub.f32 %v1997_v18, %v2005_v49  ;;  %v2037_v32 = vadd.f32 %v2029_v42, %v2021_v1  ;;  %v2387_v26 = vrot.slane %v4643_v5, %v4312_v31  ;;  %v2435_v10 = vrot.slane %v4665_v62, %v4312_v31  ;;  %3863 = vmatprep.subr.mxu0 %v4188_v40 }
 0x14a   :  { %v2940_v21 = vsel %vm2538_vm2, %v2932_v15, %v2710_v53  ;;  %v830_v7 = vxor.u32 2147483648, %v829_v63  ;;  %v2521_v57 = vsel %vm2520_vm11, %v4526_v0, %v2195_v12  ;;  %v1677_v55 = vadd.s32 3, %v5398_v60  ;;  %3864 = vmatpush3.msra.mxu0 %v3025_v6  ;;  %v3024_v12 = vld [vmem:[#allocation5] sm:$0xff]  ;;  %3879 = vmatpush3.msra.mxu1 %v3035_v9  ;;  %v4100_v53 = vld [vmem:[#allocation2 + $0x20] sm:$0x1] }
 0x14b   :  { %v2045_v13 = vmul.f32 %v5498_v48, %v5392_v43  ;;  %v2053_v56 = vmul.f32 %v2037_v32, %v5394_v17  ;;  %v2069_v5 = vmul.f32 %v5498_v48, %v5394_v17  ;;  %v2077_v50 = vmul.f32 %v2037_v32, %v5392_v43  ;;  %3865 = vmatprep.subr.mxu0 %v4188_v40 }
 0x14c   :  { %v2758_v14 = vrot.slane %v2037_v32, %v4312_v31  ;;  %v831_v15 = vsel %vm748_vm13, %v830_v7, %v829_v63  ;;  %v908_v0 = vsel %vm906_vm7, %v907_v24, %v5476_v30  ;;  %3880 = vmatprep.subr.mxu1 %v4188_v40  ;;  %v2530_v30 = vsel %vm2529_vm14, %v2521_v57, %v2243_v27  ;;  %v3033_v32 = vld [vmem:[#allocation5 + $0x48] sm:$0xff] }
 0x14d   :  { %v5526_v18 = vsub.f32 %v2045_v13, %v2053_v56  ;;  %v2085_v49 = vadd.f32 %v2077_v50, %v2069_v5  ;;  %v834_v1 = vsel %vm5357_vm12, %v4960_v23, %v831_v15  ;;  %v909_v42 = vadd.s32 %v908_v0, %v904_v38  ;;  %3866 = vmatpush3.msra.mxu0 %v3024_v12 }
 0x14e   :  { %v2948_v8 = vsel %vm2547_vm3, %v2940_v21, %v2758_v14  ;;  %4089 = vcosq.f32 %v834_v1  ;;  %v2136_v63 = vmul.f32 %v4100_v53, %v4665_v62  ;;  %3881 = vmatpush3.msra.mxu1 %v3034_v25  ;;  %v2539_v62 = vsel %vm2538_vm2, %v2530_v30, %v2291_v41  ;;  %3889 = vmatprep.subr.mxu0 %v4188_v40  ;;  %v3032_v41 = vld [vmem:[#allocation5 + $0x40] sm:$0xff]  ;;  %v2992_v14 = vpop.permute.xlu0 %2991  ;;  %v3047_v53 = vld [vmem:[#allocation5 + $0xb8] sm:$0xff] }
 0x14f   :  { %v2093_v46 = vmul.f32 %v5526_v18, %v5392_v43  ;;  %v2101_v34 = vmul.f32 %v2085_v49, %v5394_v17  ;;  %v2117_v22 = vmul.f32 %v5526_v18, %v5394_v17  ;;  %v2125_v38 = vmul.f32 %v2085_v49, %v5392_v43  ;;  %3882 = vmatprep.subr.mxu1 %v4188_v40 }
 0x150   :  { %v2806_v24 = vrot.slane %v2085_v49, %v4312_v31  ;;  %4091 = vsinq.f32 %v834_v1  ;;  %v910_v6 = vadd.s32 536870912, %v909_v42  ;;  %v2548_v7 = vsel %vm2547_vm3, %v2539_v62, %v2339_v37  ;;  %3883 = vmatpush3.msra.mxu1 %v3033_v32  ;;  %v4102_v49 = vld [vmem:[#allocation2 + $0x29] sm:$0x1] }
 0x151   :  { %v5551_v27 = vsub.f32 %v2093_v46, %v2101_v34  ;;  %v5553_v21 = vadd.f32 %v2125_v38, %v2117_v22  ;;  %v2152_v9 = vsub.f32 %v2136_v63, %v5459_v36  ;;  %v2557_v11 = vsel %vm2556_vm4, %v2548_v7, %v2387_v26  ;;  %3884 = vmatprep.subr.mxu1 %v4188_v40 }
 0x152   :  { %v2956_v57 = vsel %vm2556_vm4, %v2948_v8, %v2806_v24  ;;  %v5559_v13 = vshrl.u32 %v910_v6, 30  ;;  %v2566_v36 = vsel %vm2565_vm5, %v2557_v11, %v2435_v10  ;;  %vm4189_vm8 = vmmov 0   ;;  %3885 = vmatpush3.msra.mxu1 %v3032_v41  ;;  %v4101_v10 = vld [vmem:[#allocation2 + $0x21] sm:$0x1]  ;;  %v3044_v41 = vld [vmem:[#allocation5 + $0xa0] sm:$0xff] }
 0x153   :  { %v2165_v56 = vmul.f32 %v5551_v27, %v5394_v17  ;;  %v2173_v5 = vmul.f32 %v5553_v21, %v5392_v43  ;;  %v2854_v37 = vrot.slane %v5553_v21, %v4312_v31  ;;  %3867 = vmatprep.mubr.msk.f32.mxu0 %vm4189_vm8, %v4188_v40  ;;  %v5572_v50 = vand.u32 3, %v5398_v60  ;;  %3886 = vmatprep.mubr.msk.f32.mxu1 %vm4189_vm8, %v4188_v40 }
 0x154   :  { %v912_v26 = vshll.u32 %v5559_v13, 30  ;;  %vm3015_vm13 = vcmask 261120   ;;  %v2483_v15 = vrot.slane %v2152_v9, %v4312_v31  ;;  %vm6112_vm12 = vcmask 523264   ;;  %3908 = vmatprep.subr.mxu1 %v4188_v40 }
 0x155   :  { %v2181_v0 = vadd.f32 %v2173_v5, %v2165_v56  ;;  %v2137_v12 = vmul.f32 %v4101_v10, %v4748_v33  ;;  %v2145_v60 = vmul.f32 %v4102_v49, %v4750_v35  ;;  %v2964_v1 = vsel %vm2565_vm5, %v2956_v57, %v2854_v37  ;;  %v6158_v10 = vld [vmem:[#allocation13_spill] sm:$0xff] }
 0x156   :  { %v5582_v25 = vand.u32 3, %v1677_v55  ;;  %v5584_v8 = vsub.s32 %v909_v42, %v912_v26  ;;  %v2575_v30 = vsel %vm2574_vm6, %v2566_v36, %v2483_v15  ;;  %vm838_vm9 = vweird.f32 %v4960_v23  ;;  %v3046_v42 = vld [vmem:[#allocation5 + $0xb0] sm:$0xff]  ;;  %v3043_v26 = vld [vmem:[#allocation5 + $0x98] sm:$0xff] }
 0x157   :  { %v2902_v63 = vrot.slane %v2181_v0, %v4312_v31  ;;  %4093 = vpow2.f32 %v5337_v20  ;;  %v3016_v46 = vsel %vm3015_vm13, %v2575_v30, %v2992_v14  ;;  %vm840_vm10 = vcmp.lt.s32.totalorder %v5572_v50, 2  ;;  %v6157_v15 = vld [vmem:[#allocation12_spill] sm:$0xff] }
 0x158   :  { %vm841_vm1 = vcmp.eq.s32.totalorder %v5572_v50, 0  ;;  %v915_v35 = vsub.s32 0, %v5584_v8  ;;  %3868 = vmatmul.mubr.msk.f32.vlgmr.msra.gmra.mxu0 %vm6112_vm12, %v3016_v46  ;;  %v2199_v55 = vrot.slane %v4637_v19, %v4312_v31  ;;  %vm844_vm15 = vcmp.eq.s32.totalorder %v5572_v50, 2  ;;  %v3045_v19 = vld [vmem:[#allocation5 + $0xa8] sm:$0xff]  ;;  %v3042_v30 = vld [vmem:[#allocation5 + $0x90] sm:$0xff] }
 0x159   :  { %v2972_v34 = vsel %vm2574_vm6, %v2964_v1, %v2902_v63  ;;  %3890 = vmatpush3.msra.mxu0 %v3047_v53  ;;  %v2153_v20 = vsub.f32 %v2137_v12, %v2145_v60  ;;  %v2247_v22 = vrot.slane %v4661_v47, %v4312_v31  ;;  %vm1679_vm0 = vcmp.lt.s32.totalorder %v5582_v25, 2  ;;  %3905 = vmatprep.mubr.msk.f32.mxu0 %vm4189_vm8, %v4188_v40  ;;  %v3041_v50 = vld [vmem:[#allocation5 + $0x88] sm:$0xff] }
 0x15a   :  { %v2980_v38 = vsub.f32 0.0, %v2972_v34  ;;  %vm1680_vm7 = vcmp.eq.s32.totalorder %v5582_v25, 0  ;;  %v3736_v32 = vmin.u32 %v915_v35, %v5584_v8  ;;  %3891 = vmatprep.subr.mxu0 %v4188_v40  ;;  %vm1683_vm12 = vcmp.eq.s32.totalorder %v5582_v25, 2 }
 0x15b   :  { %v4090_v24 = vpop.eup %4089  ;;  %v905_v6 = vadd.s32 %v5475_v39, %v5453_v58  ;;  %v935_v47 = vsub.s32 4, %v5559_v13  ;;  %v2295_v62 = vrot.slane %v4693_v16, %v4312_v31  ;;  %3892 = vmatpush3.msra.mxu0 %v3046_v42  ;;  %v2343_v57 = vrot.slane %v4712_v3, %v4312_v31 }
 0x15c   :  { %3001 = vrot.lane.b32.xlu1 %v2980_v38, %s4187_s0  ;;  %v845_v7 = vxor.u32 2147483648, %v4090_v24  ;;  %v917_v9 = vclz %v3736_v32  ;;  %v2522_v11 = vsel %vm2520_vm11, %v4598_v45, %v2199_v55  ;;  %3893 = vmatprep.subr.mxu0 %v4188_v40  ;;  %v2391_v39 = vrot.slane %v4731_v4, %v4312_v31  ;;  %v55_v55 = vld [vmem:[#allocation2 + $0xe] sm:$0x1] }
 0x15d   :  { %v4092_v58 = vpop.eup %4091  ;;  %v2439_v16 = vrot.slane %v4748_v33, %v4312_v31  ;;  %v2487_v56 = vrot.slane %v2153_v20, %v4312_v31  ;;  %v2531_v5 = vsel %vm2529_vm14, %v2522_v11, %v2247_v22  ;;  %3894 = vmatpush3.msra.mxu0 %v3045_v19  ;;  %v4103_v33 = vld [vmem:[#allocation2 + $0x2a] sm:$0x1]  ;;  %v2203_v0 = vrot.slane %v6157_v15, %v4312_v31  ;;  %v3054_v15 = vld [vmem:[#allocation5 + $0xf0] sm:$0xff] }
 0x15e   :  { %v842_v37 = vxor.u32 2147483648, %v4092_v58  ;;  %v846_v3 = vsel %vm844_vm15, %v845_v7, %v4092_v58  ;;  %v1685_v45 = vsel %vm1683_vm12, %v845_v7, %v4092_v58  ;;  %v3737_v36 = vadd.s32 4294967294, %v917_v9  ;;  %3895 = vmatprep.subr.mxu0 %v4188_v40 }
 0x15f   :  { %v2540_v4 = vsel %vm2538_vm2, %v2531_v5, %v2295_v62  ;;  %3896 = vmatpush3.msra.mxu0 %v3044_v41  ;;  %v5633_v14 = vmul.f32 %v4103_v33, %v4927_v61  ;;  %v2251_v12 = vrot.slane %v6158_v10, %v4312_v31  ;;  %v46_v61 = vld [vmem:[#allocation2 + $0x6] sm:$0x1]  ;;  %v3040_v5 = vld [vmem:[#allocation5 + $0x80] sm:$0xff]  ;;  %v6163_v10 = vld [vmem:[#allocation11_spill] sm:$0xff] }
 0x160   :  { %v843_v49 = vsel %vm841_vm1, %v4090_v24, %v842_v37  ;;  %v1682_v60 = vsel %vm1680_vm7, %v4090_v24, %v842_v37  ;;  %vm3738_vm12 = vcmp.lt.s32.totalorder %v3737_v36, 0  ;;  %v2549_v1 = vsel %vm2547_vm3, %v2540_v4, %v2343_v57  ;;  %3897 = vmatprep.subr.mxu0 %v4188_v40  ;;  %v2994_v24 = vpop.permute.xlu0 %2993  ;;  %v6160_v57 = vld [vmem:[#allocation15_spill] sm:$0xff]  ;;  %v5668_v37 = vld [vmem:[#allocation2 + $0x26] sm:$0x1] }
 0x161   :  { %v847_v53 = vsel %vm840_vm10, %v843_v49, %v846_v3  ;;  %v1686_v63 = vsel %vm1679_vm0, %v1682_v60, %v1685_v45  ;;  %v920_v46 = vsel %vm3738_vm12, 0, %v3737_v36  ;;  %v2558_v35 = vsel %vm2556_vm4, %v2549_v1, %v2391_v39  ;;  %3898 = vmatpush3.msra.mxu0 %v3043_v26  ;;  %v6161_v36 = vld [vmem:[#allocation16_spill] sm:$0xff]  ;;  %v6164_v1 = vld [vmem:[#allocation17_spill] sm:$0xff] }
 0x162   :  { %v848_v42 = vsel %vm838_vm9, nan, %v847_v53  ;;  %v1687_v34 = vsel %vm838_vm9, nan, %v1686_v63  ;;  %v921_v20 = vsub.s32 32, %v920_v46  ;;  %v922_v22 = vshll.u32 %v5584_v8, %v920_v46  ;;  %3899 = vmatprep.subr.mxu0 %v4188_v40  ;;  %v6159_v8 = vld [vmem:[#allocation14_spill] sm:$0xff]  ;;  %v4104_v60 = vld [vmem:[#allocation2 + $0x22] sm:$0x1] }
 0x163   :  { %v958_v25 = vmul.f32 %v5382_v52, %v848_v42  ;;  %v1798_v38 = vmul.f32 %v5382_v52, %v1687_v34  ;;  %vm851_vm10 = vcmp.lt.s32.totalorder %v5147_v59, 0  ;;  %v925_v32 = vsub.s32 4294967266, %v920_v46  ;;  %3900 = vmatpush3.msra.mxu0 %v3042_v30 }
 0x164   :  { %v2567_v19 = vsel %vm2565_vm5, %v2558_v35, %v2439_v16  ;;  %v5660_v62 = vpop.eup %4093  ;;  %v923_v23 = vshrl.u32 %v905_v6, %v921_v20  ;;  %3901 = vmatprep.subr.mxu0 %v4188_v40  ;;  %v2299_v9 = vrot.slane %v6159_v8, %v4312_v31  ;;  %v2347_v52 = vrot.slane %v6160_v57, %v4312_v31  ;;  %v3055_v16 = vld [vmem:[#allocation5 + $0xf8] sm:$0xff] }
 0x165   :  { %v2576_v7 = vsel %vm2574_vm6, %v2567_v19, %v2487_v56  ;;  %v1806_v11 = vmul.f32 %v958_v25, %v46_v61  ;;  %v1814_v41 = vmul.f32 %v1798_v38, %v55_v55  ;;  %v1830_v58 = vmul.f32 %v1798_v38, %v46_v61  ;;  %3902 = vmatpush3.msra.mxu0 %v3041_v50  ;;  %v5670_v6 = vld [vmem:[#allocation2 + $0x2e] sm:$0x1]  ;;  %v4105_v38 = vld [vmem:[#allocation2 + $0x23] sm:$0x1]  ;;  %v4106_v57 = vld [vmem:[#allocation2 + $0x2b] sm:$0x1] }
 0x166   :  { %v1838_v39 = vmul.f32 %v958_v25, %v55_v55  ;;  %v924_v56 = vor.u32 %v923_v23, %v922_v22  ;;  %v926_v3 = vadd.s32 127, %v925_v32  ;;  %v3017_v45 = vsel %vm3015_vm13, %v2576_v7, %v2994_v24  ;;  %3903 = vmatprep.subr.mxu0 %v4188_v40  ;;  %v3053_v22 = vld [vmem:[#allocation5 + $0xe8] sm:$0xff]  ;;  %v6168_v32 = vld [vmem:[#allocation24_spill] sm:$0xff]  ;;  %v3052_v7 = vld [vmem:[#allocation5 + $0xe0] sm:$0xff] }
 0x167   :  { %v2395_v26 = vrot.slane %v6161_v36, %v4312_v31  ;;  %v5676_v4 = vsub.f32 %v1806_v11, %v1814_v41  ;;  %vm6162_vm9 = vcmask 523264   ;;  %v2523_v49 = vsel %vm2520_vm11, %v6163_v10, %v2203_v0  ;;  %3904 = vmatpush3.msra.mxu0 %v3040_v5  ;;  %v6169_v11 = vld [vmem:[#allocation25_spill] sm:$0xff] }
 0x168   :  { %v1846_v33 = vadd.f32 %v1838_v39, %v1830_v58  ;;  %3887 = vmatmul.mubr.msk.f32.vlgmr.msra.gmra.mxu1 %vm6162_vm9, %v3017_v45  ;;  %v2138_v30 = vmul.f32 %v4104_v60, %v6164_v1  ;;  %v6165_v61 = vand.u32 2147483647, %v5147_v59  ;;  %v927_v63 = vshll.u32 %v926_v3, 23  ;;  %3927 = vmatprep.subr.mxu0 %v4188_v40  ;;  %vm6172_vm15 = vmmov %vm6162_vm9 }
 0x169   :  { %v931_v46 = vcvt.s32.f32 %v924_v56  ;;  %3909 = vmatpush3.msra.mxu1 %v3055_v16  ;;  %v2443_v35 = vrot.slane %v6164_v1, %v4312_v31  ;;  %v2532_v55 = vsel %vm2529_vm14, %v2523_v49, %v2251_v12  ;;  %v1854_v0 = vmul.f32 %v5676_v4, %v5668_v37  ;;  %3924 = vmatprep.mubr.msk.f32.mxu1 %vm4189_vm8, %v4188_v40  ;;  %v3050_v1 = vld [vmem:[#allocation5 + $0xd0] sm:$0xff] }
 0x16a   :  { %vm5684_vm1 = vcmp.le.f32.partialorder %v6165_v61, 0.7853982  ;;  %v1862_v42 = vmul.f32 %v1846_v33, %v5670_v6  ;;  %v1878_v34 = vmul.f32 %v5676_v4, %v5670_v6  ;;  %v1886_v20 = vmul.f32 %v1846_v33, %v5668_v37  ;;  %3910 = vmatprep.subr.mxu1 %v4188_v40 }
 0x16b   :  { %v928_v50 = vor.u32 4788187, %v927_v63  ;;  %3911 = vmatpush3.msra.mxu1 %v3054_v15  ;;  %v2541_v25 = vsel %vm2538_vm2, %v2532_v55, %v2299_v9  ;;  %v2154_v12 = vsub.f32 %v2138_v30, %v5633_v14  ;;  %v5701_v19 = vmul.f32 %v4105_v38, %v6168_v32  ;;  %v6173_v38 = vld [vmem:[#allocation21_spill] sm:$0xff] }
 0x16c   :  { %v5704_v24 = vsub.f32 %v1854_v0, %v1862_v42  ;;  %v1894_v23 = vadd.f32 %v1886_v20, %v1878_v34  ;;  %3912 = vmatprep.subr.mxu1 %v4188_v40  ;;  %v2550_v8 = vsel %vm2547_vm3, %v2541_v25, %v2347_v52  ;;  %v5709_v41 = vmul.f32 %v4106_v57, %v6169_v11  ;;  %v6174_v57 = vld [vmem:[#allocation22_spill] sm:$0xff] }
 0x16d   :  { %v929_v9 = vand.u32 2147483647, %v928_v50  ;;  %v936_v14 = vsel %vm851_vm10, %v935_v47, %v5559_v13  ;;  %3913 = vmatpush3.msra.mxu1 %v3053_v22  ;;  %v2559_v58 = vsel %vm2556_vm4, %v2550_v8, %v2395_v26  ;;  %v2491_v39 = vrot.slane %v2154_v12, %v4312_v31  ;;  %v3051_v13 = vld [vmem:[#allocation5 + $0xd8] sm:$0xff]  ;;  %v2996_v47 = vpop.permute.xlu1 %2995  ;;  %v6170_v26 = vld [vmem:[#allocation19_spill] sm:$0xff] }
 0x16e   :  { %v1902_v52 = vmul.f32 %v5704_v24, %v5668_v37  ;;  %v1910_v16 = vmul.f32 %v1894_v23, %v5670_v6  ;;  %v1926_v5 = vmul.f32 %v5704_v24, %v5670_v6  ;;  %v1934_v56 = vmul.f32 %v1894_v23, %v5668_v37  ;;  %3914 = vmatprep.subr.mxu1 %v4188_v40  ;;  %v3063_v22 = vld [vmem:[#allocation5 + $0x138] sm:$0xff] }
 0x16f   :  { %v2618_v3 = vrot.slane %v1894_v23, %v4312_v31  ;;  %v932_v45 = vmul.f32 %v931_v46, %v929_v9  ;;  %3915 = vmatpush3.msra.mxu1 %v3052_v7  ;;  %v2568_v36 = vsel %vm2565_vm5, %v2559_v58, %v2443_v35  ;;  %v2207_v15 = vrot.slane %v6170_v26, %v4312_v31  ;;  %v6171_v35 = vld [vmem:[#allocation20_spill] sm:$0xff] }
 0x170   :  { %v5731_v10 = vsub.f32 %v1902_v52, %v1910_v16  ;;  %v1942_v49 = vadd.f32 %v1934_v56, %v1926_v5  ;;  %3916 = vmatprep.subr.mxu1 %v4188_v40  ;;  %v2577_v60 = vsel %vm2574_vm6, %v2568_v36, %v2491_v39  ;;  %v2155_v30 = vsub.f32 %v5701_v19, %v5709_v41  ;;  %v3048_v41 = vld [vmem:[#allocation5 + $0xc0] sm:$0xff]  ;;  %v3062_v16 = vld [vmem:[#allocation5 + $0x130] sm:$0xff]  ;;  %v3061_v36 = vld [vmem:[#allocation5 + $0x128] sm:$0xff] }
 0x171   :  { %v2925_v61 = vsel %vm2520_vm11, %v1846_v33, %v2618_v3  ;;  %v933_v63 = vxor.u32 2147483648, %v932_v45  ;;  %3917 = vmatpush3.msra.mxu1 %v3051_v13  ;;  %v3018_v46 = vsel %vm3015_vm13, %v2577_v60, %v2996_v47  ;;  %v2255_v55 = vrot.slane %v6171_v35, %v4312_v31  ;;  %v3049_v33 = vld [vmem:[#allocation5 + $0xc8] sm:$0xff]  ;;  %v6176_v39 = vld [vmem:[#allocation18_spill] sm:$0xff] }
 0x172   :  { %v1950_v0 = vmul.f32 %v5731_v10, %v5668_v37  ;;  %v1958_v42 = vmul.f32 %v1942_v49, %v5670_v6  ;;  %v1974_v34 = vmul.f32 %v5731_v10, %v5670_v6  ;;  %v1982_v20 = vmul.f32 %v1942_v49, %v5668_v37  ;;  %3918 = vmatprep.subr.mxu1 %v4188_v40 }
 0x173   :  { %v2666_v50 = vrot.slane %v1942_v49, %v4312_v31  ;;  %v934_v25 = vsel %vm851_vm10, %v933_v63, %v932_v45  ;;  %v938_v12 = vsel %vm5684_vm1, 0, %v936_v14  ;;  %3919 = vmatpush3.msra.mxu1 %v3050_v1  ;;  %3906 = vmatmul.mubr.msk.f32.vlgmr.msra.gmra.mxu0 %vm6172_vm15, %v3018_v46  ;;  %v2303_v19 = vrot.slane %v6173_v38, %v4312_v31  ;;  %v6175_v14 = vld [vmem:[#allocation23_spill] sm:$0xff]  ;;  %v3060_v46 = vld [vmem:[#allocation5 + $0x120] sm:$0xff] }
 0x174   :  { %v5756_v23 = vsub.f32 %v1950_v0, %v1958_v42  ;;  %v1990_v7 = vadd.f32 %v1982_v20, %v1974_v34  ;;  %v937_v8 = vsel %vm5684_vm1, %v5147_v59, %v934_v25  ;;  %3920 = vmatprep.subr.mxu1 %v4188_v40  ;;  %v2351_v11 = vrot.slane %v6174_v57, %v4312_v31  ;;  %v3059_v20 = vld [vmem:[#allocation5 + $0x118] sm:$0xff] }
 0x175   :  { %v2933_v9 = vsel %vm2529_vm14, %v2925_v61, %v2666_v50  ;;  %4095 = vcosq.f32 %v937_v8  ;;  %3921 = vmatpush3.msra.mxu1 %v3049_v33  ;;  %v2399_v58 = vrot.slane %v6175_v14, %v4312_v31  ;;  %v2524_v52 = vsel %vm2520_vm11, %v6176_v39, %v2207_v15  ;;  %3928 = vmatpush3.msra.mxu0 %v3063_v22  ;;  %v2998_v25 = vpop.permute.xlu1 %2997 }
 0x176   :  { %v1998_v53 = vmul.f32 %v5756_v23, %v5668_v37  ;;  %v2006_v5 = vmul.f32 %v1990_v7, %v5670_v6  ;;  %v2022_v56 = vmul.f32 %v5756_v23, %v5670_v6  ;;  %v2030_v13 = vmul.f32 %v1990_v7, %v5668_v37  ;;  %3922 = vmatprep.subr.mxu1 %v4188_v40 }
 0x177   :  { %v2714_v47 = vrot.slane %v1990_v7, %v4312_v31  ;;  %4097 = vsinq.f32 %v937_v8  ;;  %v2447_v3 = vrot.slane %v6168_v32, %v4312_v31  ;;  %v2533_v45 = vsel %vm2529_vm14, %v2524_v52, %v2255_v55  ;;  %3923 = vmatpush3.msra.mxu1 %v3048_v41  ;;  %3929 = vmatprep.subr.mxu0 %v4188_v40  ;;  %v3058_v7 = vld [vmem:[#allocation5 + $0x110] sm:$0xff] }
 0x178   :  { %v5781_v26 = vsub.f32 %v1998_v53, %v2006_v5  ;;  %v2038_v15 = vadd.f32 %v2030_v13, %v2022_v56  ;;  %v5783_v49 = vand.u32 3, %v938_v12  ;;  %v2542_v60 = vsel %vm2538_vm2, %v2533_v45, %v2303_v19  ;;  %3946 = vmatprep.subr.mxu1 %v4188_v40  ;;  %3930 = vmatpush3.msra.mxu0 %v3062_v16  ;;  %v4107_v8 = vld [vmem:[#allocation2 + $0x24] sm:$0x1]  ;;  %v3057_v16 = vld [vmem:[#allocation5 + $0x108] sm:$0xff]  ;;  %v4108_v53 = vld [vmem:[#allocation2 + $0x2c] sm:$0x1] }
 0x179   :  { %v2941_v1 = vsel %vm2538_vm2, %v2933_v9, %v2714_v47  ;;  %v1781_v61 = vadd.s32 3, %v938_v12  ;;  %v2495_v32 = vrot.slane %v2155_v30, %v4312_v31  ;;  %v2551_v63 = vsel %vm2547_vm3, %v2542_v60, %v2351_v11  ;;  %3931 = vmatprep.subr.mxu0 %v4188_v40  ;;  %v6177_v56 = vld [vmem:[#allocation27_spill] sm:$0xff]  ;;  %v3070_v45 = vld [vmem:[#allocation5 + $0x170] sm:$0xff]  ;;  %v3056_v60 = vld [vmem:[#allocation5 + $0x100] sm:$0xff]  ;;  %3943 = vmatprep.mubr.msk.f32.mxu0 %vm4189_vm8, %v4188_v40 }
 0x17a   :  { %v2046_v35 = vmul.f32 %v5781_v26, %v5668_v37  ;;  %v2054_v55 = vmul.f32 %v2038_v15, %v5670_v6  ;;  %v2070_v0 = vmul.f32 %v5781_v26, %v5670_v6  ;;  %v2078_v42 = vmul.f32 %v2038_v15, %v5668_v37  ;;  %3932 = vmatpush3.msra.mxu0 %v3061_v36 }
 0x17b   :  { %v2762_v34 = vrot.slane %v2038_v15, %v4312_v31  ;;  %v2560_v30 = vsel %vm2556_vm4, %v2551_v63, %v2399_v58  ;;  %3933 = vmatprep.subr.mxu0 %v4188_v40  ;;  %vm943_vm0 = vcmp.lt.s32.totalorder %v5783_v49, 2  ;;  %v5805_v38 = vand.u32 3, %v1781_v61  ;;  %v3071_v58 = vld [vmem:[#allocation5 + $0x178] sm:$0xff] }
 0x17c   :  { %v5800_v33 = vsub.f32 %v2046_v35, %v2054_v55  ;;  %v2086_v22 = vadd.f32 %v2078_v42, %v2070_v0  ;;  %v2569_v50 = vsel %vm2565_vm5, %v2560_v30, %v2447_v3  ;;  %3934 = vmatpush3.msra.mxu0 %v3060_v46  ;;  %v5810_v57 = vmul.f32 %v4107_v8, %v5315_v2  ;;  %v3069_v35 = vld [vmem:[#allocation5 + $0x168] sm:$0xff]  ;;  %v6179_v0 = vld [vmem:[#allocation26_spill] sm:$0xff] }
 0x17d   :  { %v2949_v12 = vsel %vm2547_vm3, %v2941_v1, %v2762_v34  ;;  %v2578_v19 = vsel %vm2574_vm6, %v2569_v50, %v2495_v32  ;;  %3935 = vmatprep.subr.mxu0 %v4188_v40  ;;  %vm941_vm7 = vweird.f32 %v5147_v59  ;;  %v5823_v5 = vmul.f32 %v4108_v53, %v5317_v51  ;;  %v6178_v51 = vld [vmem:[#allocation28_spill] sm:$0xff]  ;;  %v6180_v50 = vld [vmem:[#allocation29_spill] sm:$0xff] }
 0x17e   :  { %v2094_v11 = vmul.f32 %v5800_v33, %v5668_v37  ;;  %v2102_v41 = vmul.f32 %v2086_v22, %v5670_v6  ;;  %v2118_v9 = vmul.f32 %v5800_v33, %v5670_v6  ;;  %v2126_v14 = vmul.f32 %v2086_v22, %v5668_v37  ;;  %3936 = vmatpush3.msra.mxu0 %v3059_v20 }
 0x17f   :  { %v2810_v39 = vrot.slane %v2086_v22, %v4312_v31  ;;  %v3019_v52 = vsel %vm3015_vm13, %v2578_v19, %v2998_v25  ;;  %3937 = vmatprep.subr.mxu0 %v4188_v40  ;;  %v2211_v13 = vrot.slane %v6177_v56, %v4312_v31  ;;  %vm944_vm12 = vcmp.eq.s32.totalorder %v5783_v49, 0  ;;  %v3068_v22 = vld [vmem:[#allocation5 + $0x160] sm:$0xff] }
 0x180   :  { %v5827_v47 = vsub.f32 %v2094_v11, %v2102_v41  ;;  %v5829_v3 = vadd.f32 %v2126_v14, %v2118_v9  ;;  %vm947_vm10 = vcmp.eq.s32.totalorder %v5783_v49, 2  ;;  %3925 = vmatmul.mubr.msk.f32.vlgmr.msra.gmra.mxu1 %vm6162_vm9, %v3019_v52  ;;  %3938 = vmatpush3.msra.mxu0 %v3058_v7  ;;  %vm1783_vm1 = vcmp.lt.s32.totalorder %v5805_v38, 2  ;;  %v3067_v41 = vld [vmem:[#allocation5 + $0x158] sm:$0xff]  ;;  %v6182_v9 = vld [vmem:[#allocation31_spill] sm:$0xff] }
 0x181   :  { %v2957_v36 = vsel %vm2556_vm4, %v2949_v12, %v2810_v39  ;;  %3947 = vmatpush3.msra.mxu1 %v3071_v58  ;;  %3939 = vmatprep.subr.mxu0 %v4188_v40  ;;  %v2259_v15 = vrot.slane %v6178_v51, %v4312_v31  ;;  %v5841_v1 = vmul.f32 %v5551_v27, %v5392_v43  ;;  %vm1787_vm15 = vcmp.eq.s32.totalorder %v5805_v38, 2  ;;  %v6181_v12 = vld [vmem:[#allocation30_spill] sm:$0xff] }
 0x182   :  { %v4096_v61 = vpop.eup %4095  ;;  %v2166_v32 = vmul.f32 %v5827_v47, %v5670_v6  ;;  %v2174_v63 = vmul.f32 %v5829_v3, %v5668_v37  ;;  %v2858_v46 = vrot.slane %v5829_v3, %v4312_v31  ;;  %3948 = vmatprep.subr.mxu1 %v4188_v40  ;;  %3940 = vmatpush3.msra.mxu0 %v3057_v16  ;;  %vm1784_vm9 = vcmp.eq.s32.totalorder %v5805_v38, 0 }
 0x183   :  { %v948_v55 = vxor.u32 2147483648, %v4096_v61  ;;  %3949 = vmatpush3.msra.mxu1 %v3070_v45  ;;  %3941 = vmatprep.subr.mxu0 %v4188_v40  ;;  %v2156_v43 = vsub.f32 %v5810_v57, %v5823_v5  ;;  %v2525_v42 = vsel %vm2520_vm11, %v6179_v0, %v2211_v13  ;;  %v5858_v34 = vmul.f32 %v5553_v21, %v5394_v17  ;;  %v47_v45 = vld [vmem:[#allocation2 + $0x7] sm:$0x1] }
 0x184   :  { %v4098_v30 = vpop.eup %4097  ;;  %v2182_v20 = vadd.f32 %v2174_v63, %v2166_v32  ;;  %3950 = vmatprep.subr.mxu1 %v4188_v40  ;;  %v2307_v25 = vrot.slane %v6180_v50, %v4312_v31  ;;  %v2355_v19 = vrot.slane %v6181_v12, %v4312_v31  ;;  %3942 = vmatpush3.msra.mxu0 %v3056_v60 }
 0x185   :  { %v2965_v7 = vsel %vm2565_vm5, %v2957_v36, %v2858_v46  ;;  %v945_v8 = vxor.u32 2147483648, %v4098_v30  ;;  %v949_v17 = vsel %vm947_vm10, %v948_v55, %v4098_v30  ;;  %v1789_v21 = vsel %vm1787_vm15, %v948_v55, %v4098_v30  ;;  %3951 = vmatpush3.msra.mxu1 %v3069_v35  ;;  %3965 = vmatprep.subr.mxu0 %v4188_v40 }
 0x186   :  { %v2906_v11 = vrot.slane %v2182_v20, %v4312_v31  ;;  %3952 = vmatprep.subr.mxu1 %v4188_v40  ;;  %v2403_v14 = vrot.slane %v6182_v9, %v4312_v31  ;;  %v2534_v58 = vsel %vm2529_vm14, %v2525_v42, %v2259_v15  ;;  %v2157_v39 = vsub.f32 %v5841_v1, %v5858_v34  ;;  %v3066_v15 = vld [vmem:[#allocation5 + $0x150] sm:$0xff]  ;;  %v5920_v34 = vld [vmem:[#allocation2 + $0x2f] sm:$0x1] }
 0x187   :  { %v946_v52 = vsel %vm944_vm12, %v4096_v61, %v945_v8  ;;  %v1786_v16 = vsel %vm1784_vm9, %v4096_v61, %v945_v8  ;;  %3953 = vmatpush3.msra.mxu1 %v3068_v22  ;;  %v2215_v53 = vrot.slane %v5432_v28, %v4312_v31  ;;  %v2263_v56 = vrot.slane %v5449_v44, %v4312_v31  ;;  %v56_v28 = vld [vmem:[#allocation2 + $0xf] sm:$0x1] }
 0x188   :  { %v2973_v13 = vsel %vm2574_vm6, %v2965_v7, %v2906_v11  ;;  %v950_v36 = vsel %vm943_vm0, %v946_v52, %v949_v17  ;;  %v1790_v51 = vsel %vm1783_vm1, %v1786_v16, %v1789_v21  ;;  %3954 = vmatprep.subr.mxu1 %v4188_v40  ;;  %v2311_v60 = vrot.slane %v5471_v54, %v4312_v31  ;;  %v3065_v54 = vld [vmem:[#allocation5 + $0x148] sm:$0xff] }
 0x189   :  { %v2981_v1 = vsub.f32 0.0, %v2973_v13  ;;  %v951_v44 = vsel %vm941_vm7, nan, %v950_v36  ;;  %v1791_v61 = vsel %vm941_vm7, nan, %v1790_v51  ;;  %3955 = vmatpush3.msra.mxu1 %v3067_v41  ;;  %v2359_v49 = vrot.slane %v5498_v48, %v4312_v31  ;;  %3962 = vmatprep.mubr.msk.f32.mxu1 %vm4189_vm8, %v4188_v40 }
 0x18a   :  { %v959_v38 = vmul.f32 %v5660_v62, %v951_v44  ;;  %v1799_v32 = vmul.f32 %v5660_v62, %v1791_v61  ;;  %3956 = vmatprep.subr.mxu1 %v4188_v40  ;;  %v2407_v63 = vrot.slane %v5526_v18, %v4312_v31  ;;  %v2455_v59 = vrot.slane %v5551_v27, %v4312_v31  ;;  %v3064_v18 = vld [vmem:[#allocation5 + $0x140] sm:$0xff]  ;;  %v5918_v27 = vld [vmem:[#allocation2 + $0x27] sm:$0x1] }
 0x18b   :  { %3003 = vrot.lane.b32.xlu0 %v2981_v1, %s4187_s0  ;;  %3957 = vmatpush3.msra.mxu1 %v3066_v15  ;;  %v2526_v48 = vsel %vm2520_vm11, %v5404_v29, %v2215_v53  ;;  %v2142_v46 = vmul.f32 %v5827_v47, %v5668_v37  ;;  %v2150_v62 = vmul.f32 %v5829_v3, %v5670_v6 }
 0x18c   :  { %v1807_v35 = vmul.f32 %v959_v38, %v47_v45  ;;  %v1815_v55 = vmul.f32 %v1799_v32, %v56_v28  ;;  %v1831_v0 = vmul.f32 %v1799_v32, %v47_v45  ;;  %v1839_v42 = vmul.f32 %v959_v38, %v56_v28  ;;  %3958 = vmatprep.subr.mxu1 %v4188_v40 }
 0x18d   :  { %3959 = vmatpush3.msra.mxu1 %v3065_v54  ;;  %v2535_v29 = vsel %vm2529_vm14, %v2526_v48, %v2263_v56  ;;  %v2158_v37 = vsub.f32 %v2142_v46, %v2150_v62  ;;  %v2219_v6 = vrot.slane %v5704_v24, %v4312_v31  ;;  %v2267_v22 = vrot.slane %v5731_v10, %v4312_v31 }
 0x18e   :  { %v1823_v3 = vsub.f32 %v1807_v35, %v1815_v55  ;;  %v1847_v30 = vadd.f32 %v1839_v42, %v1831_v0  ;;  %v2544_v20 = vsel %vm2538_vm2, %v2535_v29, %v2311_v60  ;;  %3960 = vmatprep.subr.mxu1 %v4188_v40  ;;  %v2543_v7 = vsel %vm2538_vm2, %v2534_v58, %v2307_v25 }
 0x18f   :  { %v2503_v8 = vrot.slane %v2157_v39, %v4312_v31  ;;  %v2553_v17 = vsel %vm2547_vm3, %v2544_v20, %v2359_v49  ;;  %3961 = vmatpush3.msra.mxu1 %v3064_v18  ;;  %v2315_v24 = vrot.slane %v5756_v23, %v4312_v31  ;;  %v2363_v25 = vrot.slane %v5781_v26, %v4312_v31 }
 0x190   :  { %v1855_v21 = vmul.f32 %v1823_v3, %v5918_v27  ;;  %v1863_v11 = vmul.f32 %v1847_v30, %v5920_v34  ;;  %v1879_v41 = vmul.f32 %v1823_v3, %v5920_v34  ;;  %v1887_v10 = vmul.f32 %v1847_v30, %v5918_v27  ;;  %3984 = vmatprep.subr.mxu1 %v4188_v40 }
 0x191   :  { %v2562_v50 = vsel %vm2556_vm4, %v2553_v17, %v2407_v63  ;;  %v2411_v58 = vrot.slane %v5800_v33, %v4312_v31  ;;  %v2527_v23 = vsel %vm2520_vm11, %v5676_v4, %v2219_v6  ;;  %v2552_v56 = vsel %vm2547_vm3, %v2543_v7, %v2355_v19 }
 0x192   :  { %v1871_v39 = vsub.f32 %v1855_v21, %v1863_v11  ;;  %v1895_v52 = vadd.f32 %v1887_v10, %v1879_v41  ;;  %v2571_v16 = vsel %vm2565_vm5, %v2562_v50, %v2455_v59  ;;  %v2536_v53 = vsel %vm2529_vm14, %v2527_v23, %v2267_v22  ;;  %v3079_v41 = vld [vmem:[#allocation5 + $0x1b8] sm:$0xff] }
 0x193   :  { %v5958_v13 = vsel %vm2574_vm6, %v2571_v16, %v2503_v8  ;;  %v2459_v26 = vrot.slane %v5827_v47, %v4312_v31  ;;  %v2545_v33 = vsel %vm2538_vm2, %v2536_v53, %v2315_v24  ;;  %v2507_v19 = vrot.slane %v2158_v37, %v4312_v31 }
 0x194   :  { %v1903_v4 = vmul.f32 %v1871_v39, %v5918_v27  ;;  %v1911_v45 = vmul.f32 %v1895_v52, %v5920_v34  ;;  %v1927_v36 = vmul.f32 %v1871_v39, %v5920_v34  ;;  %v1935_v51 = vmul.f32 %v1895_v52, %v5918_v27 }
 0x195   :  { %v2622_v12 = vrot.slane %v1895_v52, %v4312_v31  ;;  %v2554_v15 = vsel %vm2547_vm3, %v2545_v33, %v2363_v25  ;;  %v2223_v60 = vrot.slane %v1871_v39, %v4312_v31  ;;  %v2451_v28 = vrot.slane %v5315_v2, %v4312_v31  ;;  %v3078_v39 = vld [vmem:[#allocation5 + $0x1b0] sm:$0xff] }
 0x196   :  { %v1919_v1 = vsub.f32 %v1903_v4, %v1911_v45  ;;  %v1943_v47 = vadd.f32 %v1935_v51, %v1927_v36  ;;  %v2563_v44 = vsel %vm2556_vm4, %v2554_v15, %v2411_v58  ;;  %v2561_v49 = vsel %vm2556_vm4, %v2552_v56, %v2403_v14  ;;  %v3077_v4 = vld [vmem:[#allocation5 + $0x1a8] sm:$0xff] }
 0x197   :  { %v2926_v61 = vsel %vm2520_vm11, %v1847_v30, %v2622_v12  ;;  %v2572_v38 = vsel %vm2565_vm5, %v2563_v44, %v2459_v26  ;;  %v2528_v32 = vsel %vm2520_vm11, %v1823_v3, %v2223_v60  ;;  %v2499_v55 = vrot.slane %v2156_v43, %v4312_v31  ;;  %v3075_v44 = vld [vmem:[#allocation5 + $0x198] sm:$0xff] }
 0x198   :  { %v1951_v54 = vmul.f32 %v1919_v1, %v5918_v27  ;;  %v1959_v63 = vmul.f32 %v1943_v47, %v5920_v34  ;;  %v1975_v59 = vmul.f32 %v1919_v1, %v5920_v34  ;;  %v1983_v2 = vmul.f32 %v1943_v47, %v5918_v27 }
 0x199   :  { %v2670_v48 = vrot.slane %v1943_v47, %v4312_v31  ;;  %v5987_v46 = vsel %vm2574_vm6, %v2572_v38, %v2507_v19  ;;  %v2271_v9 = vrot.slane %v1919_v1, %v4312_v31  ;;  %v2570_v0 = vsel %vm2565_vm5, %v2561_v49, %v2451_v28  ;;  %v3076_v19 = vld [vmem:[#allocation5 + $0x1a0] sm:$0xff] }
 0x19a   :  { %v1967_v14 = vsub.f32 %v1951_v54, %v1959_v63  ;;  %v1991_v62 = vadd.f32 %v1983_v2, %v1975_v59  ;;  %v2579_v5 = vsel %vm2574_vm6, %v2570_v0, %v2499_v55  ;;  %vm6183_vm11 = vcmask 523264   ;;  %v3074_v54 = vld [vmem:[#allocation5 + $0x190] sm:$0xff]  ;;  %v3087_v55 = vld [vmem:[#allocation5 + $0x1f8] sm:$0xff] }
 0x19b   :  { %v2934_v35 = vsel %vm2529_vm14, %v2926_v61, %v2670_v48  ;;  %v2537_v42 = vsel %vm2529_vm14, %v2528_v32, %v2271_v9  ;;  %vm6184_vm14 = vmmov %vm6183_vm11  ;;  %v3086_v0 = vld [vmem:[#allocation5 + $0x1f0] sm:$0xff] }
 0x19c   :  { %v1999_v18 = vmul.f32 %v1967_v14, %v5918_v27  ;;  %v2007_v29 = vmul.f32 %v1991_v62, %v5920_v34  ;;  %v2023_v37 = vmul.f32 %v1967_v14, %v5920_v34  ;;  %v2031_v6 = vmul.f32 %v1991_v62, %v5918_v27 }
 0x19d   :  { %v2718_v3 = vrot.slane %v1991_v62, %v4312_v31  ;;  %v2319_v30 = vrot.slane %v1967_v14, %v4312_v31  ;;  %v3072_v14 = vld [vmem:[#allocation5 + $0x180] sm:$0xff] }
 0x19e   :  { %v2015_v20 = vsub.f32 %v1999_v18, %v2007_v29  ;;  %v2039_v22 = vadd.f32 %v2031_v6, %v2023_v37  ;;  %v3084_v18 = vld [vmem:[#allocation5 + $0x1e0] sm:$0xff]  ;;  %v3083_v29 = vld [vmem:[#allocation5 + $0x1d8] sm:$0xff]  ;;  %v3081_v37 = vld [vmem:[#allocation5 + $0x1c8] sm:$0xff] }
 0x19f   :  { %v2942_v57 = vsel %vm2538_vm2, %v2934_v35, %v2718_v3  ;;  %v2546_v43 = vsel %vm2538_vm2, %v2537_v42, %v2319_v30  ;;  %v3000_v11 = vpop.permute.xlu0 %2999  ;;  %v3085_v42 = vld [vmem:[#allocation5 + $0x1e8] sm:$0xff]  ;;  %v3080_v6 = vld [vmem:[#allocation5 + $0x1c0] sm:$0xff]  ;;  %vm6185_vm2 = vmmov %vm6183_vm11 }
 0x1a0   :  { %v2047_v7 = vmul.f32 %v2015_v20, %v5918_v27  ;;  %v2055_v8 = vmul.f32 %v2039_v22, %v5920_v34  ;;  %v2071_v17 = vmul.f32 %v2015_v20, %v5920_v34  ;;  %v2079_v24 = vmul.f32 %v2039_v22, %v5918_v27 }
 0x1a1   :  { %v2766_v21 = vrot.slane %v2039_v22, %v4312_v31  ;;  %v2367_v10 = vrot.slane %v2015_v20, %v4312_v31  ;;  %v3020_v58 = vsel %vm3015_vm13, %v2579_v5, %v3000_v11 }
 0x1a2   :  { %v2063_v50 = vsub.f32 %v2047_v7, %v2055_v8  ;;  %v2087_v25 = vadd.f32 %v2079_v24, %v2071_v17  ;;  %3944 = vmatmul.mubr.msk.f32.vlgmr.msra.gmra.mxu0 %vm6183_vm11, %v3020_v58 }
 0x1a3   :  { %v2950_v23 = vsel %vm2547_vm3, %v2942_v57, %v2766_v21  ;;  %v2555_v52 = vsel %vm2547_vm3, %v2546_v43, %v2367_v10  ;;  %3966 = vmatpush3.msra.mxu0 %v3079_v41  ;;  %3981 = vmatprep.mubr.msk.f32.mxu0 %vm4189_vm8, %v4188_v40  ;;  %vm6186_vm3 = vmmov %vm6185_vm2 }
 0x1a4   :  { %v2095_v16 = vmul.f32 %v2063_v50, %v5918_v27  ;;  %v2103_v53 = vmul.f32 %v2087_v25, %v5920_v34  ;;  %v2119_v56 = vmul.f32 %v2063_v50, %v5920_v34  ;;  %v2127_v26 = vmul.f32 %v2087_v25, %v5918_v27  ;;  %3967 = vmatprep.subr.mxu0 %v4188_v40 }
 0x1a5   :  { %v2814_v33 = vrot.slane %v2087_v25, %v4312_v31  ;;  %v2415_v45 = vrot.slane %v2063_v50, %v4312_v31  ;;  %3968 = vmatpush3.msra.mxu0 %v3078_v39 }
 0x1a6   :  { %v2111_v36 = vsub.f32 %v2095_v16, %v2103_v53  ;;  %v2135_v51 = vadd.f32 %v2127_v26, %v2119_v56  ;;  %3969 = vmatprep.subr.mxu0 %v4188_v40 }
 0x1a7   :  { %v2958_v12 = vsel %vm2556_vm4, %v2950_v23, %v2814_v33  ;;  %v2564_v15 = vsel %vm2556_vm4, %v2555_v52, %v2415_v45  ;;  %3970 = vmatpush3.msra.mxu0 %v3077_v4 }
 0x1a8   :  { %v2167_v60 = vmul.f32 %v2111_v36, %v5920_v34  ;;  %v2175_v1 = vmul.f32 %v2135_v51, %v5918_v27  ;;  %v2862_v47 = vrot.slane %v2135_v51, %v4312_v31  ;;  %v2143_v28 = vmul.f32 %v2111_v36, %v5918_v27  ;;  %3971 = vmatprep.subr.mxu0 %v4188_v40  ;;  %v3073_v27 = vld [vmem:[#allocation5 + $0x188] sm:$0xff] }
 0x1a9   :  { %v2151_v61 = vmul.f32 %v2135_v51, %v5920_v34  ;;  %v2463_v49 = vrot.slane %v2111_v36, %v4312_v31  ;;  %3972 = vmatpush3.msra.mxu0 %v3076_v19 }
 0x1aa   :  { %v2183_v38 = vadd.f32 %v2175_v1, %v2167_v60  ;;  %v2966_v32 = vsel %vm2565_vm5, %v2958_v12, %v2862_v47  ;;  %3973 = vmatprep.subr.mxu0 %v4188_v40 }
 0x1ab   :  { %v2159_v63 = vsub.f32 %v2143_v28, %v2151_v61  ;;  %v2573_v59 = vsel %vm2565_vm5, %v2564_v15, %v2463_v49  ;;  %3974 = vmatpush3.msra.mxu0 %v3075_v44 }
 0x1ac   :  { %v2910_v2 = vrot.slane %v2183_v38, %v4312_v31  ;;  %3975 = vmatprep.subr.mxu0 %v4188_v40 }
 0x1ad   :  { %v2511_v34 = vrot.slane %v2159_v63, %v4312_v31  ;;  %3976 = vmatpush3.msra.mxu0 %v3074_v54 }
 0x1ae   :  { %v2974_v48 = vsel %vm2574_vm6, %v2966_v32, %v2910_v2  ;;  %3977 = vmatprep.subr.mxu0 %v4188_v40 }
 0x1af   :  { %v2982_v9 = vsub.f32 0.0, %v2974_v48  ;;  %v2582_v62 = vsel %vm2574_vm6, %v2573_v59, %v2511_v34  ;;  %3978 = vmatpush3.msra.mxu0 %v3073_v27 }
 0x1b0   :  { %3979 = vmatprep.subr.mxu0 %v4188_v40 }
 0x1b1   :  { %3005 = vrot.lane.b32.xlu1 %v2982_v9, %s4187_s0  ;;  %3980 = vmatpush3.msra.mxu0 %v3072_v14 }
 0x1ce   :  { %v3002_v35 = vpop.permute.xlu1 %3001 }
 0x1cf   :  { %v3021_v31 = vsel %vm3015_vm13, %v5958_v13, %v3002_v35  ;;  %v3082_v13 = vld [vmem:[#allocation5 + $0x1d0] sm:$0xff] }
 0x1d0   :  { %3963 = vmatmul.mubr.msk.f32.vlgmr.msra.gmra.mxu1 %vm6184_vm14, %v3021_v31 }
 0x1d1   :  { %3985 = vmatpush3.msra.mxu1 %v3087_v55  ;;  %4000 = vmatprep.mubr.msk.f32.mxu1 %vm4189_vm8, %v4188_v40 }
 0x1d2   :  { %3986 = vmatprep.subr.mxu1 %v4188_v40 }
 0x1d3   :  { %3987 = vmatpush3.msra.mxu1 %v3086_v0 }
 0x1d4   :  { %3988 = vmatprep.subr.mxu1 %v4188_v40 }
 0x1d5   :  { %3989 = vmatpush3.msra.mxu1 %v3085_v42 }
 0x1d6   :  { %3990 = vmatprep.subr.mxu1 %v4188_v40 }
 0x1d7   :  { %3991 = vmatpush3.msra.mxu1 %v3084_v18 }
 0x1d8   :  { %3992 = vmatprep.subr.mxu1 %v4188_v40 }
 0x1d9   :  { %3993 = vmatpush3.msra.mxu1 %v3083_v29 }
 0x1da   :  { %3994 = vmatprep.subr.mxu1 %v4188_v40 }
 0x1db   :  { %3995 = vmatpush3.msra.mxu1 %v3082_v13 }
 0x1dc   :  { %3996 = vmatprep.subr.mxu1 %v4188_v40 }
 0x1dd   :  { %3997 = vmatpush3.msra.mxu1 %v3081_v37 }
 0x1de   :  { %3998 = vmatprep.subr.mxu1 %v4188_v40 }
 0x1df   :  { %3999 = vmatpush3.msra.mxu1 %v3080_v6 }
 0x1fd   :  { %v3004_v3 = vpop.permute.xlu0 %3003 }
 0x1fe   :  { %v3022_v30 = vsel %vm3015_vm13, %v5987_v46, %v3004_v3 }
 0x1ff   :  { %3982 = vmatmul.mubr.msk.f32.vlgmr.msra.gmra.mxu0 %vm6185_vm2, %v3022_v30 }
 0x218   :  { %v3158_v20 = vpop.f32.mrf.mxu0 }
 0x219   :  { %v3673_v22 = vmul.f32 2.0, %v3158_v20 }
 0x21a   :  { %v3869_v57 = vpop.f32.mrf.mxu0 }
 0x21b   :  { %3681 = vst [vmem:[#allocation7] sm:$0x1] %v3673_v22 }
 0x223   :  { %v3006_v5 = vpop.permute.xlu1 %3005 }
 0x224   :  { %v3023_v43 = vsel %vm3015_vm13, %v2582_v62, %v3006_v5 }
 0x225   :  { %4001 = vmatmul.mubr.msk.f32.vlgmr.msra.gmra.mxu1 %vm6186_vm3, %v3023_v43 }
 0x228   :  { %v3231_v7 = vpop.f32.mrf.mxu1 }
 0x229   :  { %v3674_v8 = vmul.f32 2.0, %v3231_v7 }
 0x22a   :  { %v3888_v17 = vpop.f32.mrf.mxu1 }
 0x22b   :  { %3682 = vst [vmem:[#allocation7 + $0x1] sm:$0x1] %v3674_v8 }
 0x233   :  { %v3304_v40 = vpop.f32.mrf.mxu0 }
 0x234   :  { %v3675_v24 = vmul.f32 2.0, %v3304_v40 }
 0x235   :  { %v3907_v21 = vpop.f32.mrf.mxu0 }
 0x236   :  { %3683 = vst [vmem:[#allocation7 + $0x2] sm:$0x1] %v3675_v24 }
 0x240   :  { %v3377_v46 = vpop.f32.mrf.mxu1 }
 0x241   :  { %v3676_v11 = vmul.f32 2.0, %v3377_v46 }
 0x242   :  { %v3926_v41 = vpop.f32.mrf.mxu1 }
 0x243   :  { %3684 = vst [vmem:[#allocation7 + $0x3] sm:$0x1] %v3676_v11 }
 0x262   :  { %v3450_v10 = vpop.f32.mrf.mxu0 }
 0x263   :  { %v3677_v50 = vmul.f32 2.0, %v3450_v10 }
 0x264   :  { %v3945_v25 = vpop.f32.mrf.mxu0 }
 0x265   :  { %3685 = vst [vmem:[#allocation7 + $0x4] sm:$0x1] %v3677_v50 }
 0x290   :  { %v3523_v58 = vpop.f32.mrf.mxu1 }
 0x291   :  { %v3678_v23 = vmul.f32 2.0, %v3523_v58 }
 0x292   :  { %v3964_v39 = vpop.f32.mrf.mxu1 }
 0x293   :  { %3686 = vst [vmem:[#allocation7 + $0x5] sm:$0x1] %v3678_v23 }
 0x2bf   :  { %v3596_v52 = vpop.f32.mrf.mxu0 }
 0x2c0   :  { %v3679_v16 = vmul.f32 2.0, %v3596_v52 }
 0x2c1   :  { %v3983_v53 = vpop.f32.mrf.mxu0 }
 0x2c2   :  { %3687 = vst [vmem:[#allocation7 + $0x6] sm:$0x1] %v3679_v16 }
 0x2e5   :  { %v3669_v56 = vpop.f32.mrf.mxu1 }
 0x2e6   :  { %v3680_v26 = vmul.f32 2.0, %v3669_v56 }
 0x2e7   :  { %v4002_v33 = vpop.f32.mrf.mxu1 }
 0x2e8   :  { %3688 = vst [vmem:[#allocation7 + $0x7] sm:$0x1] %v3680_v26 }
 0x2e9   :  { %4160 = shalt.err (!%p4157_p0)
}
 0x2ea   :  { %3700 = dma.vmem_to_hbm [thread:$0]  %s3695_s23, 128, %s6071_s2, [#allocation4], %s4176_s12, %s4176_s12, %s4177_s13  }
 0x2eb   :  { %4173 = dma.done.wait [#allocation4], 128  }
 0x2ec   :  { %4174 = vsyncadd [#allocation4], 4294967168 }
 0x2ed   :  { %3704 = vsyncpa [#allocation3], 1 }
 0x2ee   :  { %3705 = vsyncpa [#allocation6], 1 }
 0x2ef   :  { %3706 = vsyncpa [#allocation4], 1 }

</bundles_post_ra>
